<compile_context>
chip_gen: v5e
topology: v5e:2x2
jax: 0.10.0
libtpu: 0.0.40
codegen_flags: <defaults>
</compile_context>

<pallas_src>
import jax
import jax.numpy as jnp
from jax.experimental import pallas as pl
from jax.experimental.pallas import tpu as pltpu

IN_FEATURES = 25                                   # len(features) == 25 in the reference
LAYER_DIMS = [(IN_FEATURES, 64), (64, 64), (64, 32), (32, 32),
              (32, 16), (16, 16), (16, 8)]         # fc1..fc7 (fc8 unused in forward)
OUT_FEATURES = LAYER_DIMS[-1][1]                   # 8
NUM_LAYERS = len(LAYER_DIMS)
PAD = 128                                          # lane-dense hidden width
ONES_COL = PAD - 1                                 # ones-carrier column / bias row (layers 2..7)
XPAD = 32                                          # padded input width (25 feats + zeros + ones)
ONES_COL_IN = XPAD - 1                             # ones-carrier column of the padded input


def _round_up(n, m):
    return ((n + m - 1) // m) * m


def _mlp_kernel(x_ref, w_ref, out_ref):
    # x_ref  : (tb, 32)       compute dtype; cols 0..24 = features, col 31 = 1.0
    # w_ref  : (7, 128, 128)  compute dtype; bias folded into the ones-carrier row
    # out_ref: (tb, 8)        float32
    w0 = w_ref[0][:XPAD, :]                               # (32, 128); rows 32..127 unused
    h = jnp.dot(x_ref[...], w0, preferred_element_type=jnp.float32)
    h = jnp.maximum(h, 0.0)                               # relu (dropout p=0.01 == identity)
    for layer in range(1, NUM_LAYERS):
        w = w_ref[layer]                                  # (128, 128)
        h = jnp.dot(h.astype(w.dtype), w, preferred_element_type=jnp.float32)
        h = jnp.maximum(h, 0.0)
    out_ref[...] = h[:, :OUT_FEATURES].astype(out_ref.dtype)   # only the 8 real columns


def pack_params(params, compute_dtype=jnp.bfloat16):
    """Fold each (W, b) into a lane-dense 128x128 tile; stack into (7, 128, 128).

    Layer 0 occupies rows 0..31 (matching the 32-wide padded input; bias on row 31);
    layers 1..6 use rows 0..fan_in-1 with the bias on row 127 (the ones-carrier row).
    Zero padding is numerically exact: relu(0) = 0 and zero rows/cols contribute nothing.
    Call once and reuse the packed stack across forward calls.
    """
    assert len(params) == NUM_LAYERS
    tiles = []
    for layer, (w, b) in enumerate(params):
        fan_in, fan_out = w.shape
        bias_row = ONES_COL_IN if layer == 0 else ONES_COL
        t = jnp.zeros((PAD, PAD), jnp.float32)
        t = t.at[:fan_in, :fan_out].set(w.astype(jnp.float32))
        t = t.at[bias_row, :fan_out].set(b.astype(jnp.float32))
        t = t.at[bias_row, ONES_COL].set(1.0)             # keep the ones-carrier alive
        tiles.append(t)
    return jnp.stack(tiles).astype(compute_dtype)


def neural_network_forward(x, packed_w, *, tile_batch=1024):
    """x: (batch, 25). packed_w: (7, 128, 128) from pack_params. Returns (batch, 8) f32."""
    batch, feat = x.shape
    assert feat == IN_FEATURES, feat
    compute_dtype = packed_w.dtype
    tb = min(tile_batch, _round_up(batch, 8))              # batch tile, multiple of 8
    padded_batch = _round_up(batch, tb)

    # Narrow, ones-augmented input (bias folding); padded batch rows stay all-zero.
    xp = jnp.zeros((padded_batch, XPAD), compute_dtype)
    xp = xp.at[:batch, :IN_FEATURES].set(x.astype(compute_dtype))
    xp = xp.at[:batch, ONES_COL_IN].set(1.0)

    grid = (padded_batch // tb,)
    in_specs = [pl.BlockSpec((tb, XPAD), lambda i: (i, 0)),
                # constant index_map -> single VMEM-resident weight pipeline
                pl.BlockSpec((NUM_LAYERS, PAD, PAD), lambda i: (0, 0, 0))]
    out_spec = pl.BlockSpec((tb, OUT_FEATURES), lambda i: (i, 0))
    out_shape = jax.ShapeDtypeStruct((padded_batch, OUT_FEATURES), jnp.float32)

    def run(dim_sem):
        return pl.pallas_call(
            _mlp_kernel,
            out_shape=out_shape,
            grid=grid,
            in_specs=in_specs,
            out_specs=out_spec,
            compiler_params=pltpu.CompilerParams(dimension_semantics=dim_sem),
        )(xp, packed_w)

    try:
        # v7x: shard the independent batch tiles over both TensorCores.
        out = jax.block_until_ready(run((pltpu.CORE_PARALLEL,)))
    except Exception:
        # Single-TC generations (v5e/v6e) or toolchains that reject CORE_PARALLEL here.
        out = run(("parallel",))

    return out[:batch]


def init_params(key):
    """Deterministic init mimicking nn.Linear default (uniform +/- 1/sqrt(fan_in))."""
    params = []
    for (fan_in, fan_out) in LAYER_DIMS:
        key, kw, kb = jax.random.split(key, 3)
        bound = 1.0 / (fan_in ** 0.5)
        w = jax.random.uniform(kw, (fan_in, fan_out), jnp.float32,
                               minval=-bound, maxval=bound)
        b = jax.random.uniform(kb, (fan_out,), jnp.float32,
                               minval=-bound, maxval=bound)
        params.append((w, b))
    return params


def reference_forward(x, params):
    h = x
    for w, b in params:
        h = jnp.maximum(h @ w + b, 0.0)
    return h


if __name__ == "__main__":
    key = jax.random.PRNGKey(0)
    kx1, kx2, kp = jax.random.split(key, 3)
    params = init_params(kp)

    # Check 1: f32 compute, small batch -> close match vs pure-JAX reference.
    packed_f32 = pack_params(params, compute_dtype=jnp.float32)
    batch = 64
    x = jax.random.normal(kx1, (batch, IN_FEATURES), dtype=jnp.float32)
    out = jax.block_until_ready(neural_network_forward(x, packed_f32))
    ref = reference_forward(x, params)
    assert out.shape == (batch, OUT_FEATURES), out.shape
    assert jnp.allclose(out, ref, atol=1e-4, rtol=1e-4), "f32 mismatch vs reference"

    # Check 2: default bf16 operands, non-aligned batch, multi-step pipelined grid.
    packed_bf16 = pack_params(params)                       # bf16 default
    batch2 = 200
    x2 = jax.random.normal(kx2, (batch2, IN_FEATURES), dtype=jnp.float32)
    out2 = jax.block_until_ready(
        neural_network_forward(x2, packed_bf16, tile_batch=64))
    ref2 = reference_forward(x2, params)
    assert out2.shape == (batch2, OUT_FEATURES), out2.shape
    assert jnp.allclose(out2, ref2, atol=1e-1, rtol=1e-1), "bf16/padded-batch mismatch"

    print("KERNEL_OK")
</pallas_src>

<mosaic_0001>
module attributes {stable_mosaic.version = 11 : i64} {
  func.func @_mlp_kernel(%arg0: i32, %arg1: memref<64x32xf32, #tpu.memory_space<vmem>>, %arg2: memref<7x128x128xf32, #tpu.memory_space<vmem>>, %arg3: memref<64x8xf32, #tpu.memory_space<vmem>>) attributes {dimension_semantics = [#tpu.dimension_semantics<core_parallel>], iteration_bounds = array<i64: 1>, scalar_prefetch = 0 : i64, scratch_operands = 0 : i64, tpu.core_type = #tpu.core_type<tc>, window_params = [{transform_indices = @transform_0, window_bounds = array<i64: 64, 32>}, {pipeline_mode = #tpu.pipeline_mode<synchronous>, transform_indices = @transform_1, window_bounds = array<i64: 7, 128, 128>}, {transform_indices = @transform_2, window_bounds = array<i64: 64, 8>}]} {
    %c0 = arith.constant 0 : index
    %c0_0 = arith.constant 0 : index
    %c0_1 = arith.constant 0 : index
    %0 = vector.load %arg2[%c0, %c0_0, %c0_1] : memref<7x128x128xf32, #tpu.memory_space<vmem>>, vector<1x128x128xf32>
    %1 = vector.shape_cast %0 : vector<1x128x128xf32> to vector<128x128xf32>
    %2 = vector.extract_strided_slice %1 {offsets = [0, 0], sizes = [32, 128], strides = [1, 1]} : vector<128x128xf32> to vector<32x128xf32>
    %c0_2 = arith.constant 0 : index
    %c0_3 = arith.constant 0 : index
    %3 = vector.load %arg1[%c0_2, %c0_3] : memref<64x32xf32, #tpu.memory_space<vmem>>, vector<64x32xf32>
    %cst = arith.constant dense<0.000000e+00> : vector<64x128xf32>
    %4 = tpu.matmul %3, %2, %cst {dimension_numbers = #tpu.dot_dimension_numbers<[1], [0], [0], [1], [0, 0, 1, 1], [], []>} : vector<64x32xf32>, vector<32x128xf32>, vector<64x128xf32> -> vector<64x128xf32>
    %cst_4 = arith.constant 0.000000e+00 : f32
    %5 = vector.broadcast %cst_4 : f32 to vector<64x128xf32>
    %6 = arith.maximumf %4, %5 : vector<64x128xf32>
    %c1 = arith.constant 1 : index
    %c0_5 = arith.constant 0 : index
    %c0_6 = arith.constant 0 : index
    %7 = vector.load %arg2[%c1, %c0_5, %c0_6] : memref<7x128x128xf32, #tpu.memory_space<vmem>>, vector<1x128x128xf32>
    %8 = vector.shape_cast %7 : vector<1x128x128xf32> to vector<128x128xf32>
    %cst_7 = arith.constant dense<0.000000e+00> : vector<64x128xf32>
    %9 = tpu.matmul %6, %8, %cst_7 {dimension_numbers = #tpu.dot_dimension_numbers<[1], [0], [0], [1], [0, 0, 1, 1], [], []>} : vector<64x128xf32>, vector<128x128xf32>, vector<64x128xf32> -> vector<64x128xf32>
    %cst_8 = arith.constant 0.000000e+00 : f32
    %10 = vector.broadcast %cst_8 : f32 to vector<64x128xf32>
    %11 = arith.maximumf %9, %10 : vector<64x128xf32>
    %c2 = arith.constant 2 : index
    %c0_9 = arith.constant 0 : index
    %c0_10 = arith.constant 0 : index
    %12 = vector.load %arg2[%c2, %c0_9, %c0_10] : memref<7x128x128xf32, #tpu.memory_space<vmem>>, vector<1x128x128xf32>
    %13 = vector.shape_cast %12 : vector<1x128x128xf32> to vector<128x128xf32>
    %cst_11 = arith.constant dense<0.000000e+00> : vector<64x128xf32>
    %14 = tpu.matmul %11, %13, %cst_11 {dimension_numbers = #tpu.dot_dimension_numbers<[1], [0], [0], [1], [0, 0, 1, 1], [], []>} : vector<64x128xf32>, vector<128x128xf32>, vector<64x128xf32> -> vector<64x128xf32>
    %cst_12 = arith.constant 0.000000e+00 : f32
    %15 = vector.broadcast %cst_12 : f32 to vector<64x128xf32>
    %16 = arith.maximumf %14, %15 : vector<64x128xf32>
    %c3 = arith.constant 3 : index
    %c0_13 = arith.constant 0 : index
    %c0_14 = arith.constant 0 : index
    %17 = vector.load %arg2[%c3, %c0_13, %c0_14] : memref<7x128x128xf32, #tpu.memory_space<vmem>>, vector<1x128x128xf32>
    %18 = vector.shape_cast %17 : vector<1x128x128xf32> to vector<128x128xf32>
    %cst_15 = arith.constant dense<0.000000e+00> : vector<64x128xf32>
    %19 = tpu.matmul %16, %18, %cst_15 {dimension_numbers = #tpu.dot_dimension_numbers<[1], [0], [0], [1], [0, 0, 1, 1], [], []>} : vector<64x128xf32>, vector<128x128xf32>, vector<64x128xf32> -> vector<64x128xf32>
    %cst_16 = arith.constant 0.000000e+00 : f32
    %20 = vector.broadcast %cst_16 : f32 to vector<64x128xf32>
    %21 = arith.maximumf %19, %20 : vector<64x128xf32>
    %c4 = arith.constant 4 : index
    %c0_17 = arith.constant 0 : index
    %c0_18 = arith.constant 0 : index
    %22 = vector.load %arg2[%c4, %c0_17, %c0_18] : memref<7x128x128xf32, #tpu.memory_space<vmem>>, vector<1x128x128xf32>
    %23 = vector.shape_cast %22 : vector<1x128x128xf32> to vector<128x128xf32>
    %cst_19 = arith.constant dense<0.000000e+00> : vector<64x128xf32>
    %24 = tpu.matmul %21, %23, %cst_19 {dimension_numbers = #tpu.dot_dimension_numbers<[1], [0], [0], [1], [0, 0, 1, 1], [], []>} : vector<64x128xf32>, vector<128x128xf32>, vector<64x128xf32> -> vector<64x128xf32>
    %cst_20 = arith.constant 0.000000e+00 : f32
    %25 = vector.broadcast %cst_20 : f32 to vector<64x128xf32>
    %26 = arith.maximumf %24, %25 : vector<64x128xf32>
    %c5 = arith.constant 5 : index
    %c0_21 = arith.constant 0 : index
    %c0_22 = arith.constant 0 : index
    %27 = vector.load %arg2[%c5, %c0_21, %c0_22] : memref<7x128x128xf32, #tpu.memory_space<vmem>>, vector<1x128x128xf32>
    %28 = vector.shape_cast %27 : vector<1x128x128xf32> to vector<128x128xf32>
    %cst_23 = arith.constant dense<0.000000e+00> : vector<64x128xf32>
    %29 = tpu.matmul %26, %28, %cst_23 {dimension_numbers = #tpu.dot_dimension_numbers<[1], [0], [0], [1], [0, 0, 1, 1], [], []>} : vector<64x128xf32>, vector<128x128xf32>, vector<64x128xf32> -> vector<64x128xf32>
    %cst_24 = arith.constant 0.000000e+00 : f32
    %30 = vector.broadcast %cst_24 : f32 to vector<64x128xf32>
    %31 = arith.maximumf %29, %30 : vector<64x128xf32>
    %c6 = arith.constant 6 : index
    %c0_25 = arith.constant 0 : index
    %c0_26 = arith.constant 0 : index
    %32 = vector.load %arg2[%c6, %c0_25, %c0_26] : memref<7x128x128xf32, #tpu.memory_space<vmem>>, vector<1x128x128xf32>
    %33 = vector.shape_cast %32 : vector<1x128x128xf32> to vector<128x128xf32>
    %cst_27 = arith.constant dense<0.000000e+00> : vector<64x128xf32>
    %34 = tpu.matmul %31, %33, %cst_27 {dimension_numbers = #tpu.dot_dimension_numbers<[1], [0], [0], [1], [0, 0, 1, 1], [], []>} : vector<64x128xf32>, vector<128x128xf32>, vector<64x128xf32> -> vector<64x128xf32>
    %cst_28 = arith.constant 0.000000e+00 : f32
    %35 = vector.broadcast %cst_28 : f32 to vector<64x128xf32>
    %36 = arith.maximumf %34, %35 : vector<64x128xf32>
    %37 = vector.extract_strided_slice %36 {offsets = [0, 0], sizes = [64, 8], strides = [1, 1]} : vector<64x128xf32> to vector<64x8xf32>
    %c0_29 = arith.constant 0 : index
    %c0_30 = arith.constant 0 : index
    %38 = vector.load %arg3[%c0_29, %c0_30] : memref<64x8xf32, #tpu.memory_space<vmem>>, vector<64x8xf32>
    tpu.vector_store %arg3[%c0_29, %c0_30], %37 {strides = array<i32>} : memref<64x8xf32, #tpu.memory_space<vmem>>, vector<64x8xf32>,
    return
  }
  func.func @transform_0(%arg0: i32) -> (i32, i32) {
    %c0_i32 = arith.constant 0 : i32
    %c0_i32_0 = arith.constant 0 : i32
    return %arg0, %c0_i32 : i32, i32
  }
  func.func @transform_1(%arg0: i32) -> (i32, i32, i32) {
    %c0_i32 = arith.constant 0 : i32
    %c0_i32_0 = arith.constant 0 : i32
    %c0_i32_1 = arith.constant 0 : i32
    %c0_i32_2 = arith.constant 0 : i32
    return %c0_i32, %c0_i32_0, %c0_i32_1 : i32, i32, i32
  }
  func.func @transform_2(%arg0: i32) -> (i32, i32) {
    %c0_i32 = arith.constant 0 : i32
    %c0_i32_0 = arith.constant 0 : i32
    return %arg0, %c0_i32 : i32, i32
  }
}

module attributes {stable_mosaic.version = 11 : i64} {
  func.func @_mlp_kernel(%arg0: i32, %arg1: memref<64x32xf32, #tpu.memory_space<vmem>>, %arg2: memref<7x128x128xf32, #tpu.memory_space<vmem>>, %arg3: memref<64x8xf32, #tpu.memory_space<vmem>>) attributes {dimension_semantics = [#tpu.dimension_semantics<parallel>], iteration_bounds = array<i64: 1>, scalar_prefetch = 0 : i64, scratch_operands = 0 : i64, tpu.core_type = #tpu.core_type<tc>, window_params = [{transform_indices = @transform_0, window_bounds = array<i64: 64, 32>}, {pipeline_mode = #tpu.pipeline_mode<synchronous>, transform_indices = @transform_1, window_bounds = array<i64: 7, 128, 128>}, {transform_indices = @transform_2, window_bounds = array<i64: 64, 8>}]} {
    %c0 = arith.constant 0 : index
    %c0_0 = arith.constant 0 : index
    %c0_1 = arith.constant 0 : index
    %0 = vector.load %arg2[%c0, %c0_0, %c0_1] : memref<7x128x128xf32, #tpu.memory_space<vmem>>, vector<1x128x128xf32>
    %1 = vector.shape_cast %0 : vector<1x128x128xf32> to vector<128x128xf32>
    %2 = vector.extract_strided_slice %1 {offsets = [0, 0], sizes = [32, 128], strides = [1, 1]} : vector<128x128xf32> to vector<32x128xf32>
    %c0_2 = arith.constant 0 : index
    %c0_3 = arith.constant 0 : index
    %3 = vector.load %arg1[%c0_2, %c0_3] : memref<64x32xf32, #tpu.memory_space<vmem>>, vector<64x32xf32>
    %cst = arith.constant dense<0.000000e+00> : vector<64x128xf32>
    %4 = tpu.matmul %3, %2, %cst {dimension_numbers = #tpu.dot_dimension_numbers<[1], [0], [0], [1], [0, 0, 1, 1], [], []>} : vector<64x32xf32>, vector<32x128xf32>, vector<64x128xf32> -> vector<64x128xf32>
    %cst_4 = arith.constant 0.000000e+00 : f32
    %5 = vector.broadcast %cst_4 : f32 to vector<64x128xf32>
    %6 = arith.maximumf %4, %5 : vector<64x128xf32>
    %c1 = arith.constant 1 : index
    %c0_5 = arith.constant 0 : index
    %c0_6 = arith.constant 0 : index
    %7 = vector.load %arg2[%c1, %c0_5, %c0_6] : memref<7x128x128xf32, #tpu.memory_space<vmem>>, vector<1x128x128xf32>
    %8 = vector.shape_cast %7 : vector<1x128x128xf32> to vector<128x128xf32>
    %cst_7 = arith.constant dense<0.000000e+00> : vector<64x128xf32>
    %9 = tpu.matmul %6, %8, %cst_7 {dimension_numbers = #tpu.dot_dimension_numbers<[1], [0], [0], [1], [0, 0, 1, 1], [], []>} : vector<64x128xf32>, vector<128x128xf32>, vector<64x128xf32> -> vector<64x128xf32>
    %cst_8 = arith.constant 0.000000e+00 : f32
    %10 = vector.broadcast %cst_8 : f32 to vector<64x128xf32>
    %11 = arith.maximumf %9, %10 : vector<64x128xf32>
    %c2 = arith.constant 2 : index
    %c0_9 = arith.constant 0 : index
    %c0_10 = arith.constant 0 : index
    %12 = vector.load %arg2[%c2, %c0_9, %c0_10] : memref<7x128x128xf32, #tpu.memory_space<vmem>>, vector<1x128x128xf32>
    %13 = vector.shape_cast %12 : vector<1x128x128xf32> to vector<128x128xf32>
    %cst_11 = arith.constant dense<0.000000e+00> : vector<64x128xf32>
    %14 = tpu.matmul %11, %13, %cst_11 {dimension_numbers = #tpu.dot_dimension_numbers<[1], [0], [0], [1], [0, 0, 1, 1], [], []>} : vector<64x128xf32>, vector<128x128xf32>, vector<64x128xf32> -> vector<64x128xf32>
    %cst_12 = arith.constant 0.000000e+00 : f32
    %15 = vector.broadcast %cst_12 : f32 to vector<64x128xf32>
    %16 = arith.maximumf %14, %15 : vector<64x128xf32>
    %c3 = arith.constant 3 : index
    %c0_13 = arith.constant 0 : index
    %c0_14 = arith.constant 0 : index
    %17 = vector.load %arg2[%c3, %c0_13, %c0_14] : memref<7x128x128xf32, #tpu.memory_space<vmem>>, vector<1x128x128xf32>
    %18 = vector.shape_cast %17 : vector<1x128x128xf32> to vector<128x128xf32>
    %cst_15 = arith.constant dense<0.000000e+00> : vector<64x128xf32>
    %19 = tpu.matmul %16, %18, %cst_15 {dimension_numbers = #tpu.dot_dimension_numbers<[1], [0], [0], [1], [0, 0, 1, 1], [], []>} : vector<64x128xf32>, vector<128x128xf32>, vector<64x128xf32> -> vector<64x128xf32>
    %cst_16 = arith.constant 0.000000e+00 : f32
    %20 = vector.broadcast %cst_16 : f32 to vector<64x128xf32>
    %21 = arith.maximumf %19, %20 : vector<64x128xf32>
    %c4 = arith.constant 4 : index
    %c0_17 = arith.constant 0 : index
    %c0_18 = arith.constant 0 : index
    %22 = vector.load %arg2[%c4, %c0_17, %c0_18] : memref<7x128x128xf32, #tpu.memory_space<vmem>>, vector<1x128x128xf32>
    %23 = vector.shape_cast %22 : vector<1x128x128xf32> to vector<128x128xf32>
    %cst_19 = arith.constant dense<0.000000e+00> : vector<64x128xf32>
    %24 = tpu.matmul %21, %23, %cst_19 {dimension_numbers = #tpu.dot_dimension_numbers<[1], [0], [0], [1], [0, 0, 1, 1], [], []>} : vector<64x128xf32>, vector<128x128xf32>, vector<64x128xf32> -> vector<64x128xf32>
    %cst_20 = arith.constant 0.000000e+00 : f32
    %25 = vector.broadcast %cst_20 : f32 to vector<64x128xf32>
    %26 = arith.maximumf %24, %25 : vector<64x128xf32>
    %c5 = arith.constant 5 : index
    %c0_21 = arith.constant 0 : index
    %c0_22 = arith.constant 0 : index
    %27 = vector.load %arg2[%c5, %c0_21, %c0_22] : memref<7x128x128xf32, #tpu.memory_space<vmem>>, vector<1x128x128xf32>
    %28 = vector.shape_cast %27 : vector<1x128x128xf32> to vector<128x128xf32>
    %cst_23 = arith.constant dense<0.000000e+00> : vector<64x128xf32>
    %29 = tpu.matmul %26, %28, %cst_23 {dimension_numbers = #tpu.dot_dimension_numbers<[1], [0], [0], [1], [0, 0, 1, 1], [], []>} : vector<64x128xf32>, vector<128x128xf32>, vector<64x128xf32> -> vector<64x128xf32>
    %cst_24 = arith.constant 0.000000e+00 : f32
    %30 = vector.broadcast %cst_24 : f32 to vector<64x128xf32>
    %31 = arith.maximumf %29, %30 : vector<64x128xf32>
    %c6 = arith.constant 6 : index
    %c0_25 = arith.constant 0 : index
    %c0_26 = arith.constant 0 : index
    %32 = vector.load %arg2[%c6, %c0_25, %c0_26] : memref<7x128x128xf32, #tpu.memory_space<vmem>>, vector<1x128x128xf32>
    %33 = vector.shape_cast %32 : vector<1x128x128xf32> to vector<128x128xf32>
    %cst_27 = arith.constant dense<0.000000e+00> : vector<64x128xf32>
    %34 = tpu.matmul %31, %33, %cst_27 {dimension_numbers = #tpu.dot_dimension_numbers<[1], [0], [0], [1], [0, 0, 1, 1], [], []>} : vector<64x128xf32>, vector<128x128xf32>, vector<64x128xf32> -> vector<64x128xf32>
    %cst_28 = arith.constant 0.000000e+00 : f32
    %35 = vector.broadcast %cst_28 : f32 to vector<64x128xf32>
    %36 = arith.maximumf %34, %35 : vector<64x128xf32>
    %37 = vector.extract_strided_slice %36 {offsets = [0, 0], sizes = [64, 8], strides = [1, 1]} : vector<64x128xf32> to vector<64x8xf32>
    %c0_29 = arith.constant 0 : index
    %c0_30 = arith.constant 0 : index
    %38 = vector.load %arg3[%c0_29, %c0_30] : memref<64x8xf32, #tpu.memory_space<vmem>>, vector<64x8xf32>
    tpu.vector_store %arg3[%c0_29, %c0_30], %37 {strides = array<i32>} : memref<64x8xf32, #tpu.memory_space<vmem>>, vector<64x8xf32>,
    return
  }
  func.func @transform_0(%arg0: i32) -> (i32, i32) {
    %c0_i32 = arith.constant 0 : i32
    %c0_i32_0 = arith.constant 0 : i32
    return %arg0, %c0_i32 : i32, i32
  }
  func.func @transform_1(%arg0: i32) -> (i32, i32, i32) {
    %c0_i32 = arith.constant 0 : i32
    %c0_i32_0 = arith.constant 0 : i32
    %c0_i32_1 = arith.constant 0 : i32
    %c0_i32_2 = arith.constant 0 : i32
    return %c0_i32, %c0_i32_0, %c0_i32_1 : i32, i32, i32
  }
  func.func @transform_2(%arg0: i32) -> (i32, i32) {
    %c0_i32 = arith.constant 0 : i32
    %c0_i32_0 = arith.constant 0 : i32
    return %arg0, %c0_i32 : i32, i32
  }
}

</mosaic_0001>

<bundles_post_ra>
// kernel: tpu_custom_call.1
= control target key start
LH: loop header
LB: loop body
LE: loop exit
PB: predicated region body
PF: predicated region fallthrough
CT: control target
= control target key end

     0   :  { %s3_s9 = sld [smem:[#allocation0]]   ;;  %s725_s0 = inlined_call_operand.vmem [shape: f32[64,32], index: 0, kind: input, shape index: {}]   ;;  %s726_s1 = inlined_call_operand.hbm [shape: f32[7,128,128], index: 1, kind: input, shape index: {}]   ;;  %s727_s2 = inlined_call_operand.vmem [shape: f32[64,8], index: 2, kind: output, shape index: {}]  }
   0x1   :  { %7 = vsyncpa [#allocation3], 0  ;;  %s20_s12 = sshll.u32 %s726_s1, 4  ;;  %s665_s13 = smov [#allocation2]   ;;  %s21_s12 = int_to_ptr.hbm [resolvable:$true] %s20_s12 }
   0x2   :  { %s22_s14 = sshll.u32 %s665_s13, 4  ;;  %s666_s15 = smov 128   ;;  %s23_s14 = int_to_ptr.vmem [resolvable:$true] %s22_s14 }
   0x3   :  { %s667_s16 = smov 8  }
   0x4   :  { %28 = dma.hbm_to_vmem [thread:$0]  %s21_s12, 14336, %s23_s14, [#allocation3], %s666_s15, %s666_s15, %s667_s16  }
   0x5   :  { %663 = dma.done.wait [#allocation3], 14336  }
   0x6   :  { %664 = vsyncadd [#allocation3], 4294952960  ;;  %s576_s17 = sshll.u32 %s3_s9, 3  ;;  %v58_v0 = vld [vmem:[#allocation2 + $0x18] sm:$0xff]  ;;  %v57_v1 = vld [vmem:[#allocation2 + $0x10] sm:$0xff]  ;;  %vm67_vm0 = vcmask 261120  }
   0x7   :  { %p44_p0 = scmp.lt.s32.totalorder %s576_s17, 7  ;;  %104 = vmatpush.msra.mxu0 %v58_v0  ;;  %v56_v2 = vld [vmem:[#allocation2 + $0x8] sm:$0xff]  ;;  %v55_v3 = vld [vmem:[#allocation2] sm:$0xff]  ;;  %v157_v8 = vld [vmem:[#allocation2 + $0xf8] sm:$0xff]  ;;  %vm537_vm1 = vcmask 64512  }
   0x8   :  { %v156_v9 = vld [vmem:[#allocation2 + $0xf0] sm:$0xff]  ;;  %158 = vmatpush.msra.mxu1 %v157_v8  ;;  %588 = vmatpush.msra.mxu3 %v157_v8  ;;  %v155_v10 = vld [vmem:[#allocation2 + $0xe8] sm:$0xff]  ;;  %v154_v11 = vld [vmem:[#allocation2 + $0xe0] sm:$0xff] }
   0x9   :  { %s729_s17 = smov (!%p44_p0, %s576_s17), 7  ;;  %105 = vmatpush.msra.mxu0 %v57_v1  ;;  %v153_v13 = vld [vmem:[#allocation2 + $0xd8] sm:$0xff]  ;;  %v152_v14 = vld [vmem:[#allocation2 + $0xd0] sm:$0xff]  ;;  %v151_v15 = vld [vmem:[#allocation2 + $0xc8] sm:$0xff] }
   0xa   :  { %s577_s18 = sshll.u32 %s729_s17, 3  ;;  %159 = vmatpush.msra.mxu1 %v156_v9  ;;  %589 = vmatpush.msra.mxu3 %v156_v9  ;;  %v150_v16 = vld [vmem:[#allocation2 + $0xc0] sm:$0xff]  ;;  %v149_v18 = vld [vmem:[#allocation2 + $0xb8] sm:$0xff]  ;;  %v148_v19 = vld [vmem:[#allocation2 + $0xb0] sm:$0xff] }
   0xb   :  { %s694_s20 = scalar_lea.vmem %s725_s0, %s577_s18  ;;  %106 = vmatpush.msra.mxu0 %v56_v2  ;;  %v147_v20 = vld [vmem:[#allocation2 + $0xa8] sm:$0xff]  ;;  %v146_v21 = vld [vmem:[#allocation2 + $0xa0] sm:$0xff]  ;;  %v145_v23 = vld [vmem:[#allocation2 + $0x98] sm:$0xff]  ;;  %s53_s22 = scalar_lea.vmem %s727_s2, %s577_s18 }
   0xc   :  { %v59_v4 = vld [vmem:[%s694_s20] sm:$0xff]  ;;  %v60_v5 = vld [vmem:[%s694_s20 + $0x8] sm:$0xff]  ;;  %v61_v6 = vld [vmem:[%s694_s20 + $0x10] sm:$0xff]  ;;  %160 = vmatpush.msra.mxu1 %v155_v10  ;;  %590 = vmatpush.msra.mxu3 %v155_v10 }
   0xd   :  { %107 = vmatpush.msra.mxu0 %v55_v3  ;;  %v62_v7 = vld [vmem:[%s694_s20 + $0x18] sm:$0xff]  ;;  %v63_v12 = vld [vmem:[%s694_s20 + $0x20] sm:$0xff]  ;;  %v64_v17 = vld [vmem:[%s694_s20 + $0x28] sm:$0xff] }
   0xe   :  { %580 = vmatmul.msk.f32.vlgmr.msra.gmra.mxu0 %vm67_vm0, %v59_v4  ;;  %161 = vmatpush.msra.mxu1 %v154_v11  ;;  %v65_v22 = vld [vmem:[%s694_s20 + $0x30] sm:$0xff]  ;;  %v66_v25 = vld [vmem:[%s694_s20 + $0x38] sm:$0xff]  ;;  %v143_v26 = vld [vmem:[#allocation2 + $0x88] sm:$0xff] }
   0xf   :  { %591 = vmatpush.msra.mxu3 %v154_v11  ;;  %v144_v24 = vld [vmem:[#allocation2 + $0x90] sm:$0xff]  ;;  %v142_v27 = vld [vmem:[#allocation2 + $0x80] sm:$0xff]  ;;  %v223_v36 = vld [vmem:[#allocation2 + $0x178] sm:$0xff] }
  0x10   :  { %162 = vmatpush.msra.mxu1 %v153_v13  ;;  %v222_v37 = vld [vmem:[#allocation2 + $0x170] sm:$0xff]  ;;  %224 = vmatpush.msra.mxu2 %v223_v36  ;;  %v221_v38 = vld [vmem:[#allocation2 + $0x168] sm:$0xff]  ;;  %v220_v39 = vld [vmem:[#allocation2 + $0x160] sm:$0xff] }
  0x11   :  { %592 = vmatpush.msra.mxu3 %v153_v13  ;;  %v219_v42 = vld [vmem:[#allocation2 + $0x158] sm:$0xff]  ;;  %v218_v43 = vld [vmem:[#allocation2 + $0x150] sm:$0xff]  ;;  %v217_v44 = vld [vmem:[#allocation2 + $0x148] sm:$0xff] }
  0x12   :  { %163 = vmatpush.msra.mxu1 %v152_v14  ;;  %225 = vmatpush.msra.mxu2 %v222_v37  ;;  %v216_v45 = vld [vmem:[#allocation2 + $0x140] sm:$0xff]  ;;  %v215_v48 = vld [vmem:[#allocation2 + $0x138] sm:$0xff]  ;;  %v214_v49 = vld [vmem:[#allocation2 + $0x130] sm:$0xff] }
  0x13   :  { %593 = vmatpush.msra.mxu3 %v152_v14  ;;  %v213_v50 = vld [vmem:[#allocation2 + $0x128] sm:$0xff]  ;;  %v212_v51 = vld [vmem:[#allocation2 + $0x120] sm:$0xff]  ;;  %v211_v54 = vld [vmem:[#allocation2 + $0x118] sm:$0xff] }
  0x14   :  { %164 = vmatpush.msra.mxu1 %v151_v15  ;;  %226 = vmatpush.msra.mxu2 %v221_v38  ;;  %v210_v55 = vld [vmem:[#allocation2 + $0x110] sm:$0xff]  ;;  %v209_v58 = vld [vmem:[#allocation2 + $0x108] sm:$0xff]  ;;  %v208_v59 = vld [vmem:[#allocation2 + $0x100] sm:$0xff] }
  0x15   :  { %594 = vmatpush.msra.mxu3 %v151_v15  ;;  %v289_v4 = vld [vmem:[#allocation2 + $0x1f8] sm:$0xff]  ;;  %v284_v11 = vld [vmem:[#allocation2 + $0x1d0] sm:$0xff]  ;;  %v282_v13 = vld [vmem:[#allocation2 + $0x1c0] sm:$0xff] }
  0x16   :  { %581 = vmatmul.msk.f32.gmra.mxu0 %vm67_vm0, %v60_v5  ;;  %165 = vmatpush.msra.mxu1 %v150_v16  ;;  %v288_v5 = vld [vmem:[#allocation2 + $0x1f0] sm:$0xff]  ;;  %v285_v10 = vld [vmem:[#allocation2 + $0x1d8] sm:$0xff]  ;;  %v353_v38 = vld [vmem:[#allocation2 + $0x268] sm:$0xff] }
  0x17   :  { %595 = vmatpush.msra.mxu3 %v150_v16  ;;  %227 = vmatpush.msra.mxu2 %v220_v39  ;;  %v281_v16 = vld [vmem:[#allocation2 + $0x1b8] sm:$0xff]  ;;  %v354_v37 = vld [vmem:[#allocation2 + $0x270] sm:$0xff]  ;;  %v352_v39 = vld [vmem:[#allocation2 + $0x260] sm:$0xff] }
  0x18   :  { %166 = vmatpush.msra.mxu1 %v149_v18  ;;  %v355_v36 = vld [vmem:[#allocation2 + $0x278] sm:$0xff] }
  0x19   :  { %596 = vmatpush.msra.mxu3 %v149_v18  ;;  %228 = vmatpush.msra.mxu2 %v219_v42  ;;  %v279_v18 = vld [vmem:[#allocation2 + $0x1a8] sm:$0xff]  ;;  %v351_v42 = vld [vmem:[#allocation2 + $0x258] sm:$0xff] }
  0x1a   :  { %167 = vmatpush.msra.mxu1 %v148_v19  ;;  %356 = vmatpush.msrb.mxu0 %v355_v36  ;;  %v487_v36 = vld [vmem:[#allocation2 + $0x378] sm:$0xff] }
  0x1b   :  { %597 = vmatpush.msra.mxu3 %v148_v19  ;;  %229 = vmatpush.msra.mxu2 %v218_v43  ;;  %v278_v19 = vld [vmem:[#allocation2 + $0x1a0] sm:$0xff]  ;;  %v350_v43 = vld [vmem:[#allocation2 + $0x250] sm:$0xff] }
  0x1c   :  { %168 = vmatpush.msra.mxu1 %v147_v20  ;;  %357 = vmatpush.msrb.mxu0 %v354_v37  ;;  %v486_v37 = vld [vmem:[#allocation2 + $0x370] sm:$0xff] }
  0x1d   :  { %598 = vmatpush.msra.mxu3 %v147_v20  ;;  %230 = vmatpush.msra.mxu2 %v217_v44  ;;  %v349_v44 = vld [vmem:[#allocation2 + $0x248] sm:$0xff] }
  0x1e   :  { %582 = vmatmul.msk.f32.gmra.mxu0 %vm67_vm0, %v61_v6  ;;  %169 = vmatpush.msra.mxu1 %v146_v21  ;;  %v287_v6 = vld [vmem:[#allocation2 + $0x1e8] sm:$0xff] }
  0x1f   :  { %599 = vmatpush.msra.mxu3 %v146_v21  ;;  %231 = vmatpush.msra.mxu2 %v216_v45  ;;  %v348_v45 = vld [vmem:[#allocation2 + $0x240] sm:$0xff] }
  0x20   :  { %170 = vmatpush.msra.mxu1 %v145_v23  ;;  %358 = vmatpush.msrb.mxu0 %v353_v38  ;;  %v485_v38 = vld [vmem:[#allocation2 + $0x368] sm:$0xff] }
  0x21   :  { %600 = vmatpush.msra.mxu3 %v145_v23  ;;  %232 = vmatpush.msra.mxu2 %v215_v48  ;;  %v276_v23 = vld [vmem:[#allocation2 + $0x190] sm:$0xff]  ;;  %v347_v48 = vld [vmem:[#allocation2 + $0x238] sm:$0xff] }
  0x22   :  { %171 = vmatpush.msra.mxu1 %v144_v24  ;;  %359 = vmatpush.msrb.mxu0 %v352_v39  ;;  %v484_v39 = vld [vmem:[#allocation2 + $0x360] sm:$0xff] }
  0x23   :  { %601 = vmatpush.msra.mxu3 %v144_v24  ;;  %233 = vmatpush.msra.mxu2 %v214_v49  ;;  %v346_v49 = vld [vmem:[#allocation2 + $0x230] sm:$0xff] }
  0x24   :  { %172 = vmatpush.msra.mxu1 %v143_v26  ;;  %360 = vmatpush.msrb.mxu0 %v351_v42  ;;  %v483_v42 = vld [vmem:[#allocation2 + $0x358] sm:$0xff] }
  0x25   :  { %602 = vmatpush.msra.mxu3 %v143_v26  ;;  %234 = vmatpush.msra.mxu2 %v213_v50  ;;  %v275_v26 = vld [vmem:[#allocation2 + $0x188] sm:$0xff] }
  0x26   :  { %583 = vmatmul.msk.f32.gmra.mxu0 %vm67_vm0, %v62_v7  ;;  %173 = vmatpush.msra.mxu1 %v142_v27  ;;  %v286_v7 = vld [vmem:[#allocation2 + $0x1e0] sm:$0xff]  ;;  %v345_v50 = vld [vmem:[#allocation2 + $0x228] sm:$0xff] }
  0x27   :  { %603 = vmatpush.msra.mxu3 %v142_v27  ;;  %235 = vmatpush.msra.mxu2 %v212_v51  ;;  %v274_v27 = vld [vmem:[#allocation2 + $0x180] sm:$0xff] }
  0x28   :  { %361 = vmatpush.msrb.mxu0 %v350_v43  ;;  %v344_v51 = vld [vmem:[#allocation2 + $0x220] sm:$0xff]  ;;  %v482_v43 = vld [vmem:[#allocation2 + $0x350] sm:$0xff] }
  0x29   :  { %236 = vmatpush.msra.mxu2 %v211_v54  ;;  %290 = vmatpush.msrb.mxu3 %v289_v4  ;;  %v343_v54 = vld [vmem:[#allocation2 + $0x218] sm:$0xff] }
  0x2a   :  { %362 = vmatpush.msrb.mxu0 %v349_v44  ;;  %v421_v4 = vld [vmem:[#allocation2 + $0x2f8] sm:$0xff]  ;;  %v481_v44 = vld [vmem:[#allocation2 + $0x348] sm:$0xff] }
  0x2b   :  { %237 = vmatpush.msra.mxu2 %v210_v55  ;;  %291 = vmatpush.msrb.mxu3 %v288_v5  ;;  %v342_v55 = vld [vmem:[#allocation2 + $0x210] sm:$0xff] }
  0x2c   :  { %363 = vmatpush.msrb.mxu0 %v348_v45  ;;  %v420_v5 = vld [vmem:[#allocation2 + $0x2f0] sm:$0xff]  ;;  %422 = vmatpush.msrb.mxu1 %v421_v4  ;;  %v480_v45 = vld [vmem:[#allocation2 + $0x340] sm:$0xff] }
  0x2d   :  { %238 = vmatpush.msra.mxu2 %v209_v58  ;;  %292 = vmatpush.msrb.mxu3 %v287_v6  ;;  %v341_v58 = vld [vmem:[#allocation2 + $0x208] sm:$0xff] }
  0x2e   :  { %584 = vmatmul.msk.f32.gmra.mxu0 %vm67_vm0, %v63_v12  ;;  %v283_v12 = vld [vmem:[#allocation2 + $0x1c8] sm:$0xff]  ;;  %423 = vmatpush.msrb.mxu1 %v420_v5 }
  0x2f   :  { %239 = vmatpush.msra.mxu2 %v208_v59  ;;  %293 = vmatpush.msrb.mxu3 %v286_v7  ;;  %v340_v59 = vld [vmem:[#allocation2 + $0x200] sm:$0xff]  ;;  %v419_v6 = vld [vmem:[#allocation2 + $0x2e8] sm:$0xff] }
  0x30   :  { %364 = vmatpush.msrb.mxu0 %v347_v48  ;;  %v418_v7 = vld [vmem:[#allocation2 + $0x2e0] sm:$0xff]  ;;  %424 = vmatpush.msrb.mxu1 %v419_v6  ;;  %v479_v48 = vld [vmem:[#allocation2 + $0x338] sm:$0xff] }
  0x31   :  { %294 = vmatpush.msrb.mxu3 %v285_v10  ;;  %v417_v10 = vld [vmem:[#allocation2 + $0x2d8] sm:$0xff]  ;;  %604 = vmatpush.msrb.mxu2 %v487_v36 }
  0x32   :  { %365 = vmatpush.msrb.mxu0 %v346_v49  ;;  %425 = vmatpush.msrb.mxu1 %v418_v7  ;;  %v478_v49 = vld [vmem:[#allocation2 + $0x330] sm:$0xff] }
  0x33   :  { %295 = vmatpush.msrb.mxu3 %v284_v11  ;;  %v416_v11 = vld [vmem:[#allocation2 + $0x2d0] sm:$0xff]  ;;  %606 = vmatpush.msrb.mxu2 %v486_v37 }
  0x34   :  { %366 = vmatpush.msrb.mxu0 %v345_v50  ;;  %426 = vmatpush.msrb.mxu1 %v417_v10  ;;  %v477_v50 = vld [vmem:[#allocation2 + $0x328] sm:$0xff] }
  0x35   :  { %296 = vmatpush.msrb.mxu3 %v283_v12  ;;  %v415_v12 = vld [vmem:[#allocation2 + $0x2c8] sm:$0xff]  ;;  %608 = vmatpush.msrb.mxu2 %v485_v38 }
  0x36   :  { %585 = vmatmul.msk.f32.gmra.mxu0 %vm67_vm0, %v64_v17  ;;  %v280_v17 = vld [vmem:[#allocation2 + $0x1b0] sm:$0xff]  ;;  %427 = vmatpush.msrb.mxu1 %v416_v11 }
  0x37   :  { %297 = vmatpush.msrb.mxu3 %v282_v13  ;;  %367 = vmatpush.msrb.mxu0 %v344_v51  ;;  %v414_v13 = vld [vmem:[#allocation2 + $0x2c0] sm:$0xff] }
  0x38   :  { %428 = vmatpush.msrb.mxu1 %v415_v12  ;;  %610 = vmatpush.msrb.mxu2 %v484_v39  ;;  %v476_v51 = vld [vmem:[#allocation2 + $0x320] sm:$0xff] }
  0x39   :  { %298 = vmatpush.msrb.mxu3 %v281_v16  ;;  %368 = vmatpush.msrb.mxu0 %v343_v54  ;;  %v413_v16 = vld [vmem:[#allocation2 + $0x2b8] sm:$0xff] }
  0x3a   :  { %429 = vmatpush.msrb.mxu1 %v414_v13  ;;  %612 = vmatpush.msrb.mxu2 %v483_v42  ;;  %v475_v54 = vld [vmem:[#allocation2 + $0x318] sm:$0xff] }
  0x3b   :  { %299 = vmatpush.msrb.mxu3 %v280_v17  ;;  %369 = vmatpush.msrb.mxu0 %v342_v55  ;;  %v412_v17 = vld [vmem:[#allocation2 + $0x2b0] sm:$0xff] }
  0x3c   :  { %430 = vmatpush.msrb.mxu1 %v413_v16  ;;  %614 = vmatpush.msrb.mxu2 %v482_v43  ;;  %v474_v55 = vld [vmem:[#allocation2 + $0x310] sm:$0xff] }
  0x3d   :  { %300 = vmatpush.msrb.mxu3 %v279_v18  ;;  %370 = vmatpush.msrb.mxu0 %v341_v58  ;;  %v411_v18 = vld [vmem:[#allocation2 + $0x2a8] sm:$0xff] }
  0x3e   :  { %586 = vmatmul.msk.f32.gmra.mxu0 %vm67_vm0, %v65_v22  ;;  %v277_v22 = vld [vmem:[#allocation2 + $0x198] sm:$0xff]  ;;  %431 = vmatpush.msrb.mxu1 %v412_v17  ;;  %v473_v58 = vld [vmem:[#allocation2 + $0x308] sm:$0xff] }
  0x3f   :  { %301 = vmatpush.msrb.mxu3 %v278_v19  ;;  %371 = vmatpush.msrb.mxu0 %v340_v59  ;;  %v410_v19 = vld [vmem:[#allocation2 + $0x2a0] sm:$0xff] }
  0x40   :  { %432 = vmatpush.msrb.mxu1 %v411_v18  ;;  %616 = vmatpush.msrb.mxu2 %v481_v44  ;;  %v472_v59 = vld [vmem:[#allocation2 + $0x300] sm:$0xff] }
  0x41   :  { %302 = vmatpush.msrb.mxu3 %v277_v22  ;;  %v409_v22 = vld [vmem:[#allocation2 + $0x298] sm:$0xff] }
  0x42   :  { %433 = vmatpush.msrb.mxu1 %v410_v19  ;;  %618 = vmatpush.msrb.mxu2 %v480_v45 }
  0x43   :  { %303 = vmatpush.msrb.mxu3 %v276_v23  ;;  %v408_v23 = vld [vmem:[#allocation2 + $0x290] sm:$0xff] }
  0x44   :  { %434 = vmatpush.msrb.mxu1 %v409_v22  ;;  %620 = vmatpush.msrb.mxu2 %v479_v48 }
  0x45   :  { %304 = vmatpush.msrb.mxu3 %v275_v26  ;;  %v407_v26 = vld [vmem:[#allocation2 + $0x288] sm:$0xff] }
  0x46   :  { %587 = vmatmul.msk.f32.gmra.mxu0 %vm67_vm0, %v66_v25  ;;  %435 = vmatpush.msrb.mxu1 %v408_v23 }
  0x47   :  { %305 = vmatpush.msrb.mxu3 %v274_v27  ;;  %v406_v27 = vld [vmem:[#allocation2 + $0x280] sm:$0xff]  ;;  %622 = vmatpush.msrb.mxu2 %v478_v49 }
  0x48   :  { %436 = vmatpush.msrb.mxu1 %v407_v26 }
  0x49   :  { %624 = vmatpush.msrb.mxu2 %v477_v50 }
  0x4a   :  { %437 = vmatpush.msrb.mxu1 %v406_v27 }
  0x4b   :  { %626 = vmatpush.msrb.mxu2 %v476_v51 }
  0x4d   :  { %628 = vmatpush.msrb.mxu2 %v475_v54 }
  0x4f   :  { %630 = vmatpush.msrb.mxu2 %v474_v55 }
  0x51   :  { %632 = vmatpush.msrb.mxu2 %v473_v58 }
  0x53   :  { %634 = vmatpush.msrb.mxu2 %v472_v59 }
  0x8b   :  { %v109_v28 = vpop.f32.mrf.mxu0 }
  0x8c   :  { %v133_v29 = vmax.f32 %v109_v28, 0.0 }
  0x8e   :  { %174 = vmatmul.f32.vlgmr.msra.gmra.mxu1 %v133_v29 }
  0x8f   :  { %488 = vmatpush.msra.mxu1 %v487_v36 }
  0x91   :  { %489 = vmatpush.msra.mxu1 %v486_v37 }
  0x93   :  { %v112_v30 = vpop.f32.mrf.mxu0  ;;  %490 = vmatpush.msra.mxu1 %v485_v38 }
  0x94   :  { %v134_v31 = vmax.f32 %v112_v30, 0.0 }
  0x95   :  { %491 = vmatpush.msra.mxu1 %v484_v39 }
  0x96   :  { %177 = vmatmul.f32.gmra.mxu1 %v134_v31 }
  0x97   :  { %492 = vmatpush.msra.mxu1 %v483_v42 }
  0x99   :  { %493 = vmatpush.msra.mxu1 %v482_v43 }
  0x9b   :  { %v115_v32 = vpop.f32.mrf.mxu0  ;;  %494 = vmatpush.msra.mxu1 %v481_v44 }
  0x9c   :  { %v135_v33 = vmax.f32 %v115_v32, 0.0 }
  0x9d   :  { %495 = vmatpush.msra.mxu1 %v480_v45 }
  0x9e   :  { %180 = vmatmul.f32.gmra.mxu1 %v135_v33 }
  0x9f   :  { %496 = vmatpush.msra.mxu1 %v479_v48 }
  0xa1   :  { %497 = vmatpush.msra.mxu1 %v478_v49 }
  0xa3   :  { %v118_v34 = vpop.f32.mrf.mxu0  ;;  %498 = vmatpush.msra.mxu1 %v477_v50 }
  0xa4   :  { %v136_v35 = vmax.f32 %v118_v34, 0.0 }
  0xa5   :  { %499 = vmatpush.msra.mxu1 %v476_v51 }
  0xa6   :  { %183 = vmatmul.f32.gmra.mxu1 %v136_v35 }
  0xa7   :  { %500 = vmatpush.msra.mxu1 %v475_v54 }
  0xa9   :  { %501 = vmatpush.msra.mxu1 %v474_v55 }
  0xab   :  { %v121_v40 = vpop.f32.mrf.mxu0  ;;  %502 = vmatpush.msra.mxu1 %v473_v58 }
  0xac   :  { %v137_v41 = vmax.f32 %v121_v40, 0.0 }
  0xad   :  { %503 = vmatpush.msra.mxu1 %v472_v59 }
  0xae   :  { %186 = vmatmul.f32.vlgmr.msra.gmra.mxu3 %v137_v41 }
  0xaf   :  { %605 = vmatpush.msra.mxu3 %v487_v36 }
  0xb1   :  { %607 = vmatpush.msra.mxu3 %v486_v37 }
  0xb3   :  { %v124_v46 = vpop.f32.mrf.mxu0  ;;  %609 = vmatpush.msra.mxu3 %v485_v38 }
  0xb4   :  { %v138_v47 = vmax.f32 %v124_v46, 0.0 }
  0xb5   :  { %611 = vmatpush.msra.mxu3 %v484_v39 }
  0xb6   :  { %189 = vmatmul.f32.gmra.mxu3 %v138_v47 }
  0xb7   :  { %613 = vmatpush.msra.mxu3 %v483_v42 }
  0xb9   :  { %615 = vmatpush.msra.mxu3 %v482_v43 }
  0xbb   :  { %v127_v52 = vpop.f32.mrf.mxu0  ;;  %617 = vmatpush.msra.mxu3 %v481_v44 }
  0xbc   :  { %v139_v53 = vmax.f32 %v127_v52, 0.0 }
  0xbd   :  { %619 = vmatpush.msra.mxu3 %v480_v45 }
  0xbe   :  { %192 = vmatmul.f32.gmra.mxu3 %v139_v53 }
  0xbf   :  { %621 = vmatpush.msra.mxu3 %v479_v48 }
  0xc1   :  { %623 = vmatpush.msra.mxu3 %v478_v49 }
  0xc3   :  { %v130_v56 = vpop.f32.mrf.mxu0  ;;  %625 = vmatpush.msra.mxu3 %v477_v50 }
  0xc4   :  { %v140_v57 = vmax.f32 %v130_v56, 0.0 }
  0xc5   :  { %627 = vmatpush.msra.mxu3 %v476_v51 }
  0xc6   :  { %195 = vmatmul.f32.gmra.mxu3 %v140_v57 }
  0xc7   :  { %629 = vmatpush.msra.mxu3 %v475_v54 }
  0xc9   :  { %631 = vmatpush.msra.mxu3 %v474_v55 }
  0xcb   :  { %633 = vmatpush.msra.mxu3 %v473_v58 }
  0xcd   :  { %635 = vmatpush.msra.mxu3 %v472_v59 }
 0x10b   :  { %v175_v60 = vpop.f32.mrf.mxu1 }
 0x10c   :  { %v199_v61 = vmax.f32 %v175_v60, 0.0 }
 0x10e   :  { %240 = vmatmul.f32.vlgmr.msra.gmra.mxu2 %v199_v61 }
 0x113   :  { %v178_v62 = vpop.f32.mrf.mxu1 }
 0x114   :  { %v200_v63 = vmax.f32 %v178_v62, 0.0 }
 0x116   :  { %243 = vmatmul.f32.gmra.mxu2 %v200_v63 }
 0x11b   :  { %v181_v0 = vpop.f32.mrf.mxu1 }
 0x11c   :  { %v201_v1 = vmax.f32 %v181_v0, 0.0 }
 0x11e   :  { %246 = vmatmul.f32.gmra.mxu2 %v201_v1 }
 0x123   :  { %v184_v2 = vpop.f32.mrf.mxu1 }
 0x124   :  { %v202_v3 = vmax.f32 %v184_v2, 0.0 }
 0x126   :  { %249 = vmatmul.f32.gmra.mxu2 %v202_v3 }
 0x131   :  { %v187_v8 = vpop.f32.mrf.mxu3 }
 0x132   :  { %v203_v9 = vmax.f32 %v187_v8, 0.0 }
 0x134   :  { %252 = vmatmul.f32.gmra.mxu2 %v203_v9 }
 0x139   :  { %v190_v14 = vpop.f32.mrf.mxu3 }
 0x13a   :  { %v204_v15 = vmax.f32 %v190_v14, 0.0 }
 0x13c   :  { %255 = vmatmul.f32.gmra.mxu2 %v204_v15 }
 0x141   :  { %v193_v20 = vpop.f32.mrf.mxu3 }
 0x142   :  { %v205_v21 = vmax.f32 %v193_v20, 0.0 }
 0x144   :  { %258 = vmatmul.f32.gmra.mxu2 %v205_v21 }
 0x149   :  { %v196_v24 = vpop.f32.mrf.mxu3 }
 0x14a   :  { %v206_v25 = vmax.f32 %v196_v24, 0.0 }
 0x14c   :  { %261 = vmatmul.f32.gmra.mxu2 %v206_v25 }
 0x191   :  { %v241_v28 = vpop.f32.mrf.mxu2 }
 0x192   :  { %v265_v29 = vmax.f32 %v241_v28, 0.0 }
 0x194   :  { %306 = vmatmul.f32.vlgmr.msrb.gmra.mxu3 %v265_v29 }
 0x199   :  { %v244_v30 = vpop.f32.mrf.mxu2 }
 0x19a   :  { %v266_v31 = vmax.f32 %v244_v30, 0.0 }
 0x19c   :  { %309 = vmatmul.f32.gmra.mxu3 %v266_v31 }
 0x1a1   :  { %v247_v32 = vpop.f32.mrf.mxu2 }
 0x1a2   :  { %v267_v33 = vmax.f32 %v247_v32, 0.0 }
 0x1a4   :  { %312 = vmatmul.f32.gmra.mxu3 %v267_v33 }
 0x1a9   :  { %v250_v34 = vpop.f32.mrf.mxu2 }
 0x1aa   :  { %v268_v35 = vmax.f32 %v250_v34, 0.0 }
 0x1ac   :  { %315 = vmatmul.f32.gmra.mxu3 %v268_v35 }
 0x1b7   :  { %v253_v40 = vpop.f32.mrf.mxu2 }
 0x1b8   :  { %v269_v41 = vmax.f32 %v253_v40, 0.0 }
 0x1ba   :  { %318 = vmatmul.f32.gmra.mxu3 %v269_v41 }
 0x1bf   :  { %v256_v46 = vpop.f32.mrf.mxu2 }
 0x1c0   :  { %v270_v47 = vmax.f32 %v256_v46, 0.0 }
 0x1c2   :  { %321 = vmatmul.f32.gmra.mxu3 %v270_v47 }
 0x1c7   :  { %v259_v52 = vpop.f32.mrf.mxu2 }
 0x1c8   :  { %v271_v53 = vmax.f32 %v259_v52, 0.0 }
 0x1ca   :  { %324 = vmatmul.f32.gmra.mxu3 %v271_v53 }
 0x1cf   :  { %v262_v56 = vpop.f32.mrf.mxu2 }
 0x1d0   :  { %v272_v57 = vmax.f32 %v262_v56, 0.0 }
 0x1d2   :  { %327 = vmatmul.f32.gmra.mxu3 %v272_v57 }
 0x217   :  { %v307_v60 = vpop.f32.mrf.mxu3 }
 0x218   :  { %v331_v61 = vmax.f32 %v307_v60, 0.0 }
 0x21a   :  { %372 = vmatmul.f32.vlgmr.msrb.gmra.mxu0 %v331_v61 }
 0x21f   :  { %v310_v62 = vpop.f32.mrf.mxu3 }
 0x220   :  { %v332_v63 = vmax.f32 %v310_v62, 0.0 }
 0x222   :  { %375 = vmatmul.f32.gmra.mxu0 %v332_v63 }
 0x227   :  { %v313_v0 = vpop.f32.mrf.mxu3 }
 0x228   :  { %v333_v1 = vmax.f32 %v313_v0, 0.0 }
 0x22a   :  { %378 = vmatmul.f32.gmra.mxu0 %v333_v1 }
 0x22f   :  { %v316_v2 = vpop.f32.mrf.mxu3 }
 0x230   :  { %v334_v3 = vmax.f32 %v316_v2, 0.0 }
 0x232   :  { %381 = vmatmul.f32.gmra.mxu0 %v334_v3 }
 0x23d   :  { %v319_v8 = vpop.f32.mrf.mxu3 }
 0x23e   :  { %v335_v9 = vmax.f32 %v319_v8, 0.0 }
 0x240   :  { %384 = vmatmul.f32.gmra.mxu0 %v335_v9 }
 0x245   :  { %v322_v14 = vpop.f32.mrf.mxu3 }
 0x246   :  { %v336_v15 = vmax.f32 %v322_v14, 0.0 }
 0x248   :  { %387 = vmatmul.f32.gmra.mxu0 %v336_v15 }
 0x24d   :  { %v325_v20 = vpop.f32.mrf.mxu3 }
 0x24e   :  { %v337_v21 = vmax.f32 %v325_v20, 0.0 }
 0x250   :  { %390 = vmatmul.f32.gmra.mxu0 %v337_v21 }
 0x255   :  { %v328_v24 = vpop.f32.mrf.mxu3 }
 0x256   :  { %v338_v25 = vmax.f32 %v328_v24, 0.0 }
 0x258   :  { %393 = vmatmul.f32.gmra.mxu0 %v338_v25 }
 0x297   :  { %v373_v28 = vpop.f32.mrf.mxu0 }
 0x298   :  { %v397_v29 = vmax.f32 %v373_v28, 0.0 }
 0x29a   :  { %438 = vmatmul.f32.vlgmr.msrb.gmra.mxu1 %v397_v29 }
 0x29f   :  { %v376_v30 = vpop.f32.mrf.mxu0 }
 0x2a0   :  { %v398_v31 = vmax.f32 %v376_v30, 0.0 }
 0x2a2   :  { %441 = vmatmul.f32.gmra.mxu1 %v398_v31 }
 0x2a7   :  { %v379_v32 = vpop.f32.mrf.mxu0 }
 0x2a8   :  { %v399_v33 = vmax.f32 %v379_v32, 0.0 }
 0x2aa   :  { %444 = vmatmul.f32.gmra.mxu1 %v399_v33 }
 0x2af   :  { %v382_v34 = vpop.f32.mrf.mxu0 }
 0x2b0   :  { %v400_v35 = vmax.f32 %v382_v34, 0.0 }
 0x2b2   :  { %447 = vmatmul.f32.gmra.mxu1 %v400_v35 }
 0x2bd   :  { %v385_v40 = vpop.f32.mrf.mxu0 }
 0x2be   :  { %v401_v41 = vmax.f32 %v385_v40, 0.0 }
 0x2c0   :  { %450 = vmatmul.f32.gmra.mxu1 %v401_v41 }
 0x2c5   :  { %v388_v46 = vpop.f32.mrf.mxu0 }
 0x2c6   :  { %v402_v47 = vmax.f32 %v388_v46, 0.0 }
 0x2c8   :  { %453 = vmatmul.f32.gmra.mxu1 %v402_v47 }
 0x2cd   :  { %v391_v52 = vpop.f32.mrf.mxu0 }
 0x2ce   :  { %v403_v53 = vmax.f32 %v391_v52, 0.0 }
 0x2d0   :  { %456 = vmatmul.f32.gmra.mxu1 %v403_v53 }
 0x2d5   :  { %v394_v56 = vpop.f32.mrf.mxu0 }
 0x2d6   :  { %v404_v57 = vmax.f32 %v394_v56, 0.0 }
 0x2d8   :  { %459 = vmatmul.f32.gmra.mxu1 %v404_v57 }
 0x317   :  { %v439_v60 = vpop.f32.mrf.mxu1 }
 0x318   :  { %v463_v61 = vmax.f32 %v439_v60, 0.0 }
 0x31a   :  { %504 = vmatmul.f32.vlgmr.msra.gmra.mxu1 %v463_v61 }
 0x31f   :  { %v442_v62 = vpop.f32.mrf.mxu1 }
 0x320   :  { %v464_v63 = vmax.f32 %v442_v62, 0.0 }
 0x322   :  { %507 = vmatmul.f32.vlgmr.msrb.gmra.mxu2 %v464_v63 }
 0x327   :  { %v445_v0 = vpop.f32.mrf.mxu1 }
 0x328   :  { %v465_v1 = vmax.f32 %v445_v0, 0.0 }
 0x32a   :  { %510 = vmatmul.f32.gmra.mxu2 %v465_v1 }
 0x32f   :  { %v448_v2 = vpop.f32.mrf.mxu1 }
 0x330   :  { %v466_v3 = vmax.f32 %v448_v2, 0.0 }
 0x332   :  { %513 = vmatmul.f32.gmra.mxu2 %v466_v3 }
 0x33d   :  { %v451_v4 = vpop.f32.mrf.mxu1 }
 0x33e   :  { %v467_v5 = vmax.f32 %v451_v4, 0.0 }
 0x340   :  { %516 = vmatmul.f32.gmra.mxu2 %v467_v5 }
 0x345   :  { %v454_v6 = vpop.f32.mrf.mxu1 }
 0x346   :  { %v468_v7 = vmax.f32 %v454_v6, 0.0 }
 0x348   :  { %519 = vmatmul.f32.gmra.mxu2 %v468_v7 }
 0x34d   :  { %v457_v8 = vpop.f32.mrf.mxu1 }
 0x34e   :  { %v469_v9 = vmax.f32 %v457_v8, 0.0 }
 0x350   :  { %522 = vmatmul.f32.gmra.mxu2 %v469_v9 }
 0x355   :  { %v460_v10 = vpop.f32.mrf.mxu1 }
 0x356   :  { %v470_v11 = vmax.f32 %v460_v10, 0.0 }
 0x358   :  { %525 = vmatmul.f32.vlgmr.msra.gmra.mxu3 %v470_v11 }
 0x397   :  { %v505_v12 = vpop.f32.mrf.mxu1 }
 0x398   :  { %v529_v13 = vmax.f32 %v505_v12, 0.0 }
 0x39a   :  { %538 = vst.msk [vmem:[%s53_s22] sm:$0xff] %vm537_vm1, %v529_v13 }
 0x3a5   :  { %v508_v14 = vpop.f32.mrf.mxu2 }
 0x3a6   :  { %v530_v15 = vmax.f32 %v508_v14, 0.0 }
 0x3a8   :  { %539 = vst.msk [vmem:[%s53_s22 + $0x8] sm:$0xff] %vm537_vm1, %v530_v15 }
 0x3ad   :  { %v511_v16 = vpop.f32.mrf.mxu2 }
 0x3ae   :  { %v531_v17 = vmax.f32 %v511_v16, 0.0 }
 0x3b0   :  { %540 = vst.msk [vmem:[%s53_s22 + $0x10] sm:$0xff] %vm537_vm1, %v531_v17 }
 0x3b5   :  { %v514_v18 = vpop.f32.mrf.mxu2 }
 0x3b6   :  { %v532_v19 = vmax.f32 %v514_v18, 0.0 }
 0x3b8   :  { %541 = vst.msk [vmem:[%s53_s22 + $0x18] sm:$0xff] %vm537_vm1, %v532_v19 }
 0x3c3   :  { %v517_v20 = vpop.f32.mrf.mxu2 }
 0x3c4   :  { %v533_v21 = vmax.f32 %v517_v20, 0.0 }
 0x3c6   :  { %542 = vst.msk [vmem:[%s53_s22 + $0x20] sm:$0xff] %vm537_vm1, %v533_v21 }
 0x3cb   :  { %v520_v22 = vpop.f32.mrf.mxu2 }
 0x3cc   :  { %v534_v23 = vmax.f32 %v520_v22, 0.0 }
 0x3ce   :  { %543 = vst.msk [vmem:[%s53_s22 + $0x28] sm:$0xff] %vm537_vm1, %v534_v23 }
 0x3d3   :  { %v523_v24 = vpop.f32.mrf.mxu2 }
 0x3d4   :  { %v535_v25 = vmax.f32 %v523_v24, 0.0 }
 0x3d6   :  { %544 = vst.msk [vmem:[%s53_s22 + $0x30] sm:$0xff] %vm537_vm1, %v535_v25 }
 0x3db   :  { %v526_v26 = vpop.f32.mrf.mxu3 }
 0x3dc   :  { %v536_v27 = vmax.f32 %v526_v26, 0.0 }
 0x3de   :  { %545 = vst.msk [vmem:[%s53_s22 + $0x38] sm:$0xff] %vm537_vm1, %v536_v27 }
 0x3df   :  { %561 = vsyncpa [#allocation3], 1 }

// kernel: tpu_custom_call.1
= control target key start
LH: loop header
LB: loop body
LE: loop exit
PB: predicated region body
PF: predicated region fallthrough
CT: control target
= control target key end

     0   :  { %7 = vsyncpa [#allocation3], 0  ;;  %s608_s12 = smov [#allocation2]   ;;  %s609_s14 = smov 128   ;;  %s693_s0 = inlined_call_operand.vmem [shape: f32[64,32], index: 0, kind: input, shape index: {}]   ;;  %s694_s1 = inlined_call_operand.hbm [shape: f32[7,128,128], index: 1, kind: input, shape index: {}]   ;;  %s695_s2 = inlined_call_operand.vmem [shape: f32[64,8], index: 2, kind: output, shape index: {}]  }
   0x1   :  { %s14_s11 = sshll.u32 %s694_s1, 4  ;;  %s16_s13 = sshll.u32 %s608_s12, 4  ;;  %s15_s11 = int_to_ptr.hbm [resolvable:$true] %s14_s11  ;;  %s17_s13 = int_to_ptr.vmem [resolvable:$true] %s16_s13 }
   0x2   :  { %s610_s15 = smov 8  }
   0x3   :  { %22 = dma.hbm_to_vmem [thread:$0]  %s15_s11, 14336, %s17_s13, [#allocation3], %s609_s14, %s609_s14, %s610_s15  }
   0x4   :  { %606 = dma.done.wait [#allocation3], 14336  }
   0x5   :  { %607 = vsyncadd [#allocation3], 4294952960  ;;  %v30_v0 = vld [vmem:[#allocation2 + $0x18] sm:$0xff]  ;;  %v29_v1 = vld [vmem:[#allocation2 + $0x10] sm:$0xff]  ;;  %vm39_vm0 = vcmask 261120   ;;  %vm509_vm1 = vcmask 64512  }
   0x6   :  { %76 = vmatpush.msra.mxu0 %v30_v0  ;;  %v28_v2 = vld [vmem:[#allocation2 + $0x8] sm:$0xff]  ;;  %v27_v3 = vld [vmem:[#allocation2] sm:$0xff]  ;;  %v33_v6 = vld [vmem:[%s693_s0 + $0x10] sm:$0xff] }
   0x7   :  { %v31_v4 = vld [vmem:[%s693_s0] sm:$0xff]  ;;  %v32_v5 = vld [vmem:[%s693_s0 + $0x8] sm:$0xff]  ;;  %v34_v7 = vld [vmem:[%s693_s0 + $0x18] sm:$0xff] }
   0x8   :  { %77 = vmatpush.msra.mxu0 %v29_v1  ;;  %v129_v8 = vld [vmem:[#allocation2 + $0xf8] sm:$0xff]  ;;  %v128_v9 = vld [vmem:[#allocation2 + $0xf0] sm:$0xff]  ;;  %v127_v10 = vld [vmem:[#allocation2 + $0xe8] sm:$0xff] }
   0x9   :  { %130 = vmatpush.msra.mxu1 %v129_v8  ;;  %531 = vmatpush.msra.mxu3 %v129_v8  ;;  %v126_v11 = vld [vmem:[#allocation2 + $0xe0] sm:$0xff]  ;;  %v125_v13 = vld [vmem:[#allocation2 + $0xd8] sm:$0xff]  ;;  %v124_v14 = vld [vmem:[#allocation2 + $0xd0] sm:$0xff] }
   0xa   :  { %78 = vmatpush.msra.mxu0 %v28_v2  ;;  %v35_v12 = vld [vmem:[%s693_s0 + $0x20] sm:$0xff]  ;;  %v123_v15 = vld [vmem:[#allocation2 + $0xc8] sm:$0xff]  ;;  %v121_v18 = vld [vmem:[#allocation2 + $0xb8] sm:$0xff] }
   0xb   :  { %131 = vmatpush.msra.mxu1 %v128_v9  ;;  %532 = vmatpush.msra.mxu3 %v128_v9  ;;  %v122_v16 = vld [vmem:[#allocation2 + $0xc0] sm:$0xff]  ;;  %v36_v17 = vld [vmem:[%s693_s0 + $0x28] sm:$0xff]  ;;  %v120_v19 = vld [vmem:[#allocation2 + $0xb0] sm:$0xff] }
   0xc   :  { %79 = vmatpush.msra.mxu0 %v27_v3  ;;  %v119_v20 = vld [vmem:[#allocation2 + $0xa8] sm:$0xff]  ;;  %v118_v21 = vld [vmem:[#allocation2 + $0xa0] sm:$0xff]  ;;  %v37_v22 = vld [vmem:[%s693_s0 + $0x30] sm:$0xff] }
   0xd   :  { %523 = vmatmul.msk.f32.vlgmr.msra.gmra.mxu0 %vm39_vm0, %v31_v4  ;;  %132 = vmatpush.msra.mxu1 %v127_v10  ;;  %v117_v23 = vld [vmem:[#allocation2 + $0x98] sm:$0xff]  ;;  %v116_v24 = vld [vmem:[#allocation2 + $0x90] sm:$0xff]  ;;  %v115_v26 = vld [vmem:[#allocation2 + $0x88] sm:$0xff] }
   0xe   :  { %533 = vmatpush.msra.mxu3 %v127_v10  ;;  %v38_v25 = vld [vmem:[%s693_s0 + $0x38] sm:$0xff]  ;;  %v114_v27 = vld [vmem:[#allocation2 + $0x80] sm:$0xff]  ;;  %v194_v37 = vld [vmem:[#allocation2 + $0x170] sm:$0xff] }
   0xf   :  { %133 = vmatpush.msra.mxu1 %v126_v11  ;;  %v195_v36 = vld [vmem:[#allocation2 + $0x178] sm:$0xff]  ;;  %v193_v38 = vld [vmem:[#allocation2 + $0x168] sm:$0xff]  ;;  %v192_v39 = vld [vmem:[#allocation2 + $0x160] sm:$0xff] }
  0x10   :  { %534 = vmatpush.msra.mxu3 %v126_v11  ;;  %196 = vmatpush.msra.mxu2 %v195_v36  ;;  %v191_v42 = vld [vmem:[#allocation2 + $0x158] sm:$0xff]  ;;  %v190_v43 = vld [vmem:[#allocation2 + $0x150] sm:$0xff]  ;;  %v189_v44 = vld [vmem:[#allocation2 + $0x148] sm:$0xff] }
  0x11   :  { %134 = vmatpush.msra.mxu1 %v125_v13  ;;  %v188_v45 = vld [vmem:[#allocation2 + $0x140] sm:$0xff]  ;;  %v187_v48 = vld [vmem:[#allocation2 + $0x138] sm:$0xff]  ;;  %v186_v49 = vld [vmem:[#allocation2 + $0x130] sm:$0xff] }
  0x12   :  { %535 = vmatpush.msra.mxu3 %v125_v13  ;;  %197 = vmatpush.msra.mxu2 %v194_v37  ;;  %v185_v50 = vld [vmem:[#allocation2 + $0x128] sm:$0xff]  ;;  %v184_v51 = vld [vmem:[#allocation2 + $0x120] sm:$0xff]  ;;  %v183_v54 = vld [vmem:[#allocation2 + $0x118] sm:$0xff] }
  0x13   :  { %135 = vmatpush.msra.mxu1 %v124_v14  ;;  %v182_v55 = vld [vmem:[#allocation2 + $0x110] sm:$0xff]  ;;  %v181_v58 = vld [vmem:[#allocation2 + $0x108] sm:$0xff]  ;;  %v180_v59 = vld [vmem:[#allocation2 + $0x100] sm:$0xff] }
  0x14   :  { %536 = vmatpush.msra.mxu3 %v124_v14  ;;  %198 = vmatpush.msra.mxu2 %v193_v38  ;;  %v261_v4 = vld [vmem:[#allocation2 + $0x1f8] sm:$0xff]  ;;  %v256_v11 = vld [vmem:[#allocation2 + $0x1d0] sm:$0xff]  ;;  %v254_v13 = vld [vmem:[#allocation2 + $0x1c0] sm:$0xff] }
  0x15   :  { %524 = vmatmul.msk.f32.gmra.mxu0 %vm39_vm0, %v32_v5  ;;  %136 = vmatpush.msra.mxu1 %v123_v15  ;;  %v260_v5 = vld [vmem:[#allocation2 + $0x1f0] sm:$0xff]  ;;  %v257_v10 = vld [vmem:[#allocation2 + $0x1d8] sm:$0xff]  ;;  %v325_v38 = vld [vmem:[#allocation2 + $0x268] sm:$0xff] }
  0x16   :  { %537 = vmatpush.msra.mxu3 %v123_v15  ;;  %199 = vmatpush.msra.mxu2 %v192_v39  ;;  %v327_v36 = vld [vmem:[#allocation2 + $0x278] sm:$0xff]  ;;  %v326_v37 = vld [vmem:[#allocation2 + $0x270] sm:$0xff]  ;;  %v324_v39 = vld [vmem:[#allocation2 + $0x260] sm:$0xff] }
  0x17   :  { %137 = vmatpush.msra.mxu1 %v122_v16  ;;  %328 = vmatpush.msrb.mxu0 %v327_v36  ;;  %v459_v36 = vld [vmem:[#allocation2 + $0x378] sm:$0xff] }
  0x18   :  { %538 = vmatpush.msra.mxu3 %v122_v16  ;;  %200 = vmatpush.msra.mxu2 %v191_v42  ;;  %v253_v16 = vld [vmem:[#allocation2 + $0x1b8] sm:$0xff] }
  0x19   :  { %138 = vmatpush.msra.mxu1 %v121_v18  ;;  %329 = vmatpush.msrb.mxu0 %v326_v37  ;;  %v323_v42 = vld [vmem:[#allocation2 + $0x258] sm:$0xff]  ;;  %v458_v37 = vld [vmem:[#allocation2 + $0x370] sm:$0xff] }
  0x1a   :  { %539 = vmatpush.msra.mxu3 %v121_v18  ;;  %201 = vmatpush.msra.mxu2 %v190_v43  ;;  %v251_v18 = vld [vmem:[#allocation2 + $0x1a8] sm:$0xff]  ;;  %v322_v43 = vld [vmem:[#allocation2 + $0x250] sm:$0xff] }
  0x1b   :  { %139 = vmatpush.msra.mxu1 %v120_v19  ;;  %330 = vmatpush.msrb.mxu0 %v325_v38  ;;  %v457_v38 = vld [vmem:[#allocation2 + $0x368] sm:$0xff] }
  0x1c   :  { %540 = vmatpush.msra.mxu3 %v120_v19  ;;  %202 = vmatpush.msra.mxu2 %v189_v44  ;;  %v250_v19 = vld [vmem:[#allocation2 + $0x1a0] sm:$0xff]  ;;  %v321_v44 = vld [vmem:[#allocation2 + $0x248] sm:$0xff] }
  0x1d   :  { %525 = vmatmul.msk.f32.gmra.mxu0 %vm39_vm0, %v33_v6  ;;  %140 = vmatpush.msra.mxu1 %v119_v20  ;;  %v259_v6 = vld [vmem:[#allocation2 + $0x1e8] sm:$0xff] }
  0x1e   :  { %541 = vmatpush.msra.mxu3 %v119_v20  ;;  %203 = vmatpush.msra.mxu2 %v188_v45  ;;  %v320_v45 = vld [vmem:[#allocation2 + $0x240] sm:$0xff] }
  0x1f   :  { %141 = vmatpush.msra.mxu1 %v118_v21  ;;  %331 = vmatpush.msrb.mxu0 %v324_v39  ;;  %v456_v39 = vld [vmem:[#allocation2 + $0x360] sm:$0xff] }
  0x20   :  { %542 = vmatpush.msra.mxu3 %v118_v21  ;;  %204 = vmatpush.msra.mxu2 %v187_v48  ;;  %v319_v48 = vld [vmem:[#allocation2 + $0x238] sm:$0xff] }
  0x21   :  { %142 = vmatpush.msra.mxu1 %v117_v23  ;;  %332 = vmatpush.msrb.mxu0 %v323_v42  ;;  %v455_v42 = vld [vmem:[#allocation2 + $0x358] sm:$0xff] }
  0x22   :  { %543 = vmatpush.msra.mxu3 %v117_v23  ;;  %205 = vmatpush.msra.mxu2 %v186_v49  ;;  %v248_v23 = vld [vmem:[#allocation2 + $0x190] sm:$0xff] }
  0x23   :  { %143 = vmatpush.msra.mxu1 %v116_v24  ;;  %333 = vmatpush.msrb.mxu0 %v322_v43  ;;  %v318_v49 = vld [vmem:[#allocation2 + $0x230] sm:$0xff] }
  0x24   :  { %544 = vmatpush.msra.mxu3 %v116_v24  ;;  %206 = vmatpush.msra.mxu2 %v185_v50  ;;  %v317_v50 = vld [vmem:[#allocation2 + $0x228] sm:$0xff]  ;;  %v454_v43 = vld [vmem:[#allocation2 + $0x350] sm:$0xff] }
  0x25   :  { %526 = vmatmul.msk.f32.gmra.mxu0 %vm39_vm0, %v34_v7  ;;  %144 = vmatpush.msra.mxu1 %v115_v26  ;;  %v258_v7 = vld [vmem:[#allocation2 + $0x1e0] sm:$0xff] }
  0x26   :  { %545 = vmatpush.msra.mxu3 %v115_v26  ;;  %207 = vmatpush.msra.mxu2 %v184_v51  ;;  %v247_v26 = vld [vmem:[#allocation2 + $0x188] sm:$0xff]  ;;  %v316_v51 = vld [vmem:[#allocation2 + $0x220] sm:$0xff] }
  0x27   :  { %145 = vmatpush.msra.mxu1 %v114_v27  ;;  %334 = vmatpush.msrb.mxu0 %v321_v44  ;;  %v453_v44 = vld [vmem:[#allocation2 + $0x348] sm:$0xff] }
  0x28   :  { %546 = vmatpush.msra.mxu3 %v114_v27  ;;  %208 = vmatpush.msra.mxu2 %v183_v54  ;;  %v246_v27 = vld [vmem:[#allocation2 + $0x180] sm:$0xff]  ;;  %v315_v54 = vld [vmem:[#allocation2 + $0x218] sm:$0xff] }
  0x29   :  { %335 = vmatpush.msrb.mxu0 %v320_v45  ;;  %v452_v45 = vld [vmem:[#allocation2 + $0x340] sm:$0xff] }
  0x2a   :  { %209 = vmatpush.msra.mxu2 %v182_v55  ;;  %262 = vmatpush.msrb.mxu3 %v261_v4  ;;  %v314_v55 = vld [vmem:[#allocation2 + $0x210] sm:$0xff]  ;;  %v393_v4 = vld [vmem:[#allocation2 + $0x2f8] sm:$0xff] }
  0x2b   :  { %336 = vmatpush.msrb.mxu0 %v319_v48  ;;  %394 = vmatpush.msrb.mxu1 %v393_v4  ;;  %v451_v48 = vld [vmem:[#allocation2 + $0x338] sm:$0xff] }
  0x2c   :  { %210 = vmatpush.msra.mxu2 %v181_v58  ;;  %263 = vmatpush.msrb.mxu3 %v260_v5  ;;  %v313_v58 = vld [vmem:[#allocation2 + $0x208] sm:$0xff]  ;;  %v392_v5 = vld [vmem:[#allocation2 + $0x2f0] sm:$0xff] }
  0x2d   :  { %527 = vmatmul.msk.f32.gmra.mxu0 %vm39_vm0, %v35_v12  ;;  %v255_v12 = vld [vmem:[#allocation2 + $0x1c8] sm:$0xff]  ;;  %395 = vmatpush.msrb.mxu1 %v392_v5 }
  0x2e   :  { %211 = vmatpush.msra.mxu2 %v180_v59  ;;  %264 = vmatpush.msrb.mxu3 %v259_v6  ;;  %v312_v59 = vld [vmem:[#allocation2 + $0x200] sm:$0xff]  ;;  %v391_v6 = vld [vmem:[#allocation2 + $0x2e8] sm:$0xff] }
  0x2f   :  { %337 = vmatpush.msrb.mxu0 %v318_v49  ;;  %396 = vmatpush.msrb.mxu1 %v391_v6  ;;  %v450_v49 = vld [vmem:[#allocation2 + $0x330] sm:$0xff] }
  0x30   :  { %265 = vmatpush.msrb.mxu3 %v258_v7  ;;  %v390_v7 = vld [vmem:[#allocation2 + $0x2e0] sm:$0xff]  ;;  %547 = vmatpush.msrb.mxu2 %v459_v36 }
  0x31   :  { %338 = vmatpush.msrb.mxu0 %v317_v50  ;;  %397 = vmatpush.msrb.mxu1 %v390_v7  ;;  %v449_v50 = vld [vmem:[#allocation2 + $0x328] sm:$0xff] }
  0x32   :  { %266 = vmatpush.msrb.mxu3 %v257_v10  ;;  %v389_v10 = vld [vmem:[#allocation2 + $0x2d8] sm:$0xff]  ;;  %549 = vmatpush.msrb.mxu2 %v458_v37 }
  0x33   :  { %339 = vmatpush.msrb.mxu0 %v316_v51  ;;  %398 = vmatpush.msrb.mxu1 %v389_v10  ;;  %v448_v51 = vld [vmem:[#allocation2 + $0x320] sm:$0xff] }
  0x34   :  { %267 = vmatpush.msrb.mxu3 %v256_v11  ;;  %v388_v11 = vld [vmem:[#allocation2 + $0x2d0] sm:$0xff]  ;;  %551 = vmatpush.msrb.mxu2 %v457_v38 }
  0x35   :  { %528 = vmatmul.msk.f32.gmra.mxu0 %vm39_vm0, %v36_v17  ;;  %v252_v17 = vld [vmem:[#allocation2 + $0x1b0] sm:$0xff]  ;;  %399 = vmatpush.msrb.mxu1 %v388_v11 }
  0x36   :  { %268 = vmatpush.msrb.mxu3 %v255_v12  ;;  %340 = vmatpush.msrb.mxu0 %v315_v54  ;;  %v387_v12 = vld [vmem:[#allocation2 + $0x2c8] sm:$0xff]  ;;  %v447_v54 = vld [vmem:[#allocation2 + $0x318] sm:$0xff] }
  0x37   :  { %400 = vmatpush.msrb.mxu1 %v387_v12  ;;  %553 = vmatpush.msrb.mxu2 %v456_v39 }
  0x38   :  { %269 = vmatpush.msrb.mxu3 %v254_v13  ;;  %341 = vmatpush.msrb.mxu0 %v314_v55  ;;  %v386_v13 = vld [vmem:[#allocation2 + $0x2c0] sm:$0xff]  ;;  %v446_v55 = vld [vmem:[#allocation2 + $0x310] sm:$0xff] }
  0x39   :  { %401 = vmatpush.msrb.mxu1 %v386_v13  ;;  %555 = vmatpush.msrb.mxu2 %v455_v42 }
  0x3a   :  { %270 = vmatpush.msrb.mxu3 %v253_v16  ;;  %342 = vmatpush.msrb.mxu0 %v313_v58  ;;  %v385_v16 = vld [vmem:[#allocation2 + $0x2b8] sm:$0xff]  ;;  %v445_v58 = vld [vmem:[#allocation2 + $0x308] sm:$0xff] }
  0x3b   :  { %402 = vmatpush.msrb.mxu1 %v385_v16  ;;  %557 = vmatpush.msrb.mxu2 %v454_v43 }
  0x3c   :  { %271 = vmatpush.msrb.mxu3 %v252_v17  ;;  %343 = vmatpush.msrb.mxu0 %v312_v59  ;;  %v384_v17 = vld [vmem:[#allocation2 + $0x2b0] sm:$0xff]  ;;  %v444_v59 = vld [vmem:[#allocation2 + $0x300] sm:$0xff] }
  0x3d   :  { %529 = vmatmul.msk.f32.gmra.mxu0 %vm39_vm0, %v37_v22  ;;  %v249_v22 = vld [vmem:[#allocation2 + $0x198] sm:$0xff]  ;;  %403 = vmatpush.msrb.mxu1 %v384_v17 }
  0x3e   :  { %272 = vmatpush.msrb.mxu3 %v251_v18  ;;  %v383_v18 = vld [vmem:[#allocation2 + $0x2a8] sm:$0xff]  ;;  %559 = vmatpush.msrb.mxu2 %v453_v44 }
  0x3f   :  { %404 = vmatpush.msrb.mxu1 %v383_v18 }
  0x40   :  { %273 = vmatpush.msrb.mxu3 %v250_v19  ;;  %v382_v19 = vld [vmem:[#allocation2 + $0x2a0] sm:$0xff]  ;;  %561 = vmatpush.msrb.mxu2 %v452_v45 }
  0x41   :  { %405 = vmatpush.msrb.mxu1 %v382_v19 }
  0x42   :  { %274 = vmatpush.msrb.mxu3 %v249_v22  ;;  %v381_v22 = vld [vmem:[#allocation2 + $0x298] sm:$0xff]  ;;  %563 = vmatpush.msrb.mxu2 %v451_v48 }
  0x43   :  { %406 = vmatpush.msrb.mxu1 %v381_v22 }
  0x44   :  { %275 = vmatpush.msrb.mxu3 %v248_v23  ;;  %v380_v23 = vld [vmem:[#allocation2 + $0x290] sm:$0xff]  ;;  %565 = vmatpush.msrb.mxu2 %v450_v49 }
  0x45   :  { %530 = vmatmul.msk.f32.gmra.mxu0 %vm39_vm0, %v38_v25  ;;  %407 = vmatpush.msrb.mxu1 %v380_v23 }
  0x46   :  { %276 = vmatpush.msrb.mxu3 %v247_v26  ;;  %v379_v26 = vld [vmem:[#allocation2 + $0x288] sm:$0xff]  ;;  %567 = vmatpush.msrb.mxu2 %v449_v50 }
  0x47   :  { %408 = vmatpush.msrb.mxu1 %v379_v26 }
  0x48   :  { %277 = vmatpush.msrb.mxu3 %v246_v27  ;;  %v378_v27 = vld [vmem:[#allocation2 + $0x280] sm:$0xff]  ;;  %569 = vmatpush.msrb.mxu2 %v448_v51 }
  0x49   :  { %409 = vmatpush.msrb.mxu1 %v378_v27 }
  0x4a   :  { %571 = vmatpush.msrb.mxu2 %v447_v54 }
  0x4c   :  { %573 = vmatpush.msrb.mxu2 %v446_v55 }
  0x4e   :  { %575 = vmatpush.msrb.mxu2 %v445_v58 }
  0x50   :  { %577 = vmatpush.msrb.mxu2 %v444_v59 }
  0x8a   :  { %v81_v28 = vpop.f32.mrf.mxu0 }
  0x8b   :  { %v105_v29 = vmax.f32 %v81_v28, 0.0 }
  0x8d   :  { %146 = vmatmul.f32.vlgmr.msra.gmra.mxu1 %v105_v29 }
  0x8e   :  { %460 = vmatpush.msra.mxu1 %v459_v36 }
  0x90   :  { %461 = vmatpush.msra.mxu1 %v458_v37 }
  0x92   :  { %v84_v30 = vpop.f32.mrf.mxu0  ;;  %462 = vmatpush.msra.mxu1 %v457_v38 }
  0x93   :  { %v106_v31 = vmax.f32 %v84_v30, 0.0 }
  0x94   :  { %463 = vmatpush.msra.mxu1 %v456_v39 }
  0x95   :  { %149 = vmatmul.f32.gmra.mxu1 %v106_v31 }
  0x96   :  { %464 = vmatpush.msra.mxu1 %v455_v42 }
  0x98   :  { %465 = vmatpush.msra.mxu1 %v454_v43 }
  0x9a   :  { %v87_v32 = vpop.f32.mrf.mxu0  ;;  %466 = vmatpush.msra.mxu1 %v453_v44 }
  0x9b   :  { %v107_v33 = vmax.f32 %v87_v32, 0.0 }
  0x9c   :  { %467 = vmatpush.msra.mxu1 %v452_v45 }
  0x9d   :  { %152 = vmatmul.f32.gmra.mxu1 %v107_v33 }
  0x9e   :  { %468 = vmatpush.msra.mxu1 %v451_v48 }
  0xa0   :  { %469 = vmatpush.msra.mxu1 %v450_v49 }
  0xa2   :  { %v90_v34 = vpop.f32.mrf.mxu0  ;;  %470 = vmatpush.msra.mxu1 %v449_v50 }
  0xa3   :  { %v108_v35 = vmax.f32 %v90_v34, 0.0 }
  0xa4   :  { %471 = vmatpush.msra.mxu1 %v448_v51 }
  0xa5   :  { %155 = vmatmul.f32.gmra.mxu1 %v108_v35 }
  0xa6   :  { %472 = vmatpush.msra.mxu1 %v447_v54 }
  0xa8   :  { %473 = vmatpush.msra.mxu1 %v446_v55 }
  0xaa   :  { %v93_v40 = vpop.f32.mrf.mxu0  ;;  %474 = vmatpush.msra.mxu1 %v445_v58 }
  0xab   :  { %v109_v41 = vmax.f32 %v93_v40, 0.0 }
  0xac   :  { %475 = vmatpush.msra.mxu1 %v444_v59 }
  0xad   :  { %158 = vmatmul.f32.vlgmr.msra.gmra.mxu3 %v109_v41 }
  0xae   :  { %548 = vmatpush.msra.mxu3 %v459_v36 }
  0xb0   :  { %550 = vmatpush.msra.mxu3 %v458_v37 }
  0xb2   :  { %v96_v46 = vpop.f32.mrf.mxu0  ;;  %552 = vmatpush.msra.mxu3 %v457_v38 }
  0xb3   :  { %v110_v47 = vmax.f32 %v96_v46, 0.0 }
  0xb4   :  { %554 = vmatpush.msra.mxu3 %v456_v39 }
  0xb5   :  { %161 = vmatmul.f32.gmra.mxu3 %v110_v47 }
  0xb6   :  { %556 = vmatpush.msra.mxu3 %v455_v42 }
  0xb8   :  { %558 = vmatpush.msra.mxu3 %v454_v43 }
  0xba   :  { %v99_v52 = vpop.f32.mrf.mxu0  ;;  %560 = vmatpush.msra.mxu3 %v453_v44 }
  0xbb   :  { %v111_v53 = vmax.f32 %v99_v52, 0.0 }
  0xbc   :  { %562 = vmatpush.msra.mxu3 %v452_v45 }
  0xbd   :  { %164 = vmatmul.f32.gmra.mxu3 %v111_v53 }
  0xbe   :  { %564 = vmatpush.msra.mxu3 %v451_v48 }
  0xc0   :  { %566 = vmatpush.msra.mxu3 %v450_v49 }
  0xc2   :  { %v102_v56 = vpop.f32.mrf.mxu0  ;;  %568 = vmatpush.msra.mxu3 %v449_v50 }
  0xc3   :  { %v112_v57 = vmax.f32 %v102_v56, 0.0 }
  0xc4   :  { %570 = vmatpush.msra.mxu3 %v448_v51 }
  0xc5   :  { %167 = vmatmul.f32.gmra.mxu3 %v112_v57 }
  0xc6   :  { %572 = vmatpush.msra.mxu3 %v447_v54 }
  0xc8   :  { %574 = vmatpush.msra.mxu3 %v446_v55 }
  0xca   :  { %576 = vmatpush.msra.mxu3 %v445_v58 }
  0xcc   :  { %578 = vmatpush.msra.mxu3 %v444_v59 }
 0x10a   :  { %v147_v60 = vpop.f32.mrf.mxu1 }
 0x10b   :  { %v171_v61 = vmax.f32 %v147_v60, 0.0 }
 0x10d   :  { %212 = vmatmul.f32.vlgmr.msra.gmra.mxu2 %v171_v61 }
 0x112   :  { %v150_v62 = vpop.f32.mrf.mxu1 }
 0x113   :  { %v172_v63 = vmax.f32 %v150_v62, 0.0 }
 0x115   :  { %215 = vmatmul.f32.gmra.mxu2 %v172_v63 }
 0x11a   :  { %v153_v0 = vpop.f32.mrf.mxu1 }
 0x11b   :  { %v173_v1 = vmax.f32 %v153_v0, 0.0 }
 0x11d   :  { %218 = vmatmul.f32.gmra.mxu2 %v173_v1 }
 0x122   :  { %v156_v2 = vpop.f32.mrf.mxu1 }
 0x123   :  { %v174_v3 = vmax.f32 %v156_v2, 0.0 }
 0x125   :  { %221 = vmatmul.f32.gmra.mxu2 %v174_v3 }
 0x130   :  { %v159_v8 = vpop.f32.mrf.mxu3 }
 0x131   :  { %v175_v9 = vmax.f32 %v159_v8, 0.0 }
 0x133   :  { %224 = vmatmul.f32.gmra.mxu2 %v175_v9 }
 0x138   :  { %v162_v14 = vpop.f32.mrf.mxu3 }
 0x139   :  { %v176_v15 = vmax.f32 %v162_v14, 0.0 }
 0x13b   :  { %227 = vmatmul.f32.gmra.mxu2 %v176_v15 }
 0x140   :  { %v165_v20 = vpop.f32.mrf.mxu3 }
 0x141   :  { %v177_v21 = vmax.f32 %v165_v20, 0.0 }
 0x143   :  { %230 = vmatmul.f32.gmra.mxu2 %v177_v21 }
 0x148   :  { %v168_v24 = vpop.f32.mrf.mxu3 }
 0x149   :  { %v178_v25 = vmax.f32 %v168_v24, 0.0 }
 0x14b   :  { %233 = vmatmul.f32.gmra.mxu2 %v178_v25 }
 0x190   :  { %v213_v28 = vpop.f32.mrf.mxu2 }
 0x191   :  { %v237_v29 = vmax.f32 %v213_v28, 0.0 }
 0x193   :  { %278 = vmatmul.f32.vlgmr.msrb.gmra.mxu3 %v237_v29 }
 0x198   :  { %v216_v30 = vpop.f32.mrf.mxu2 }
 0x199   :  { %v238_v31 = vmax.f32 %v216_v30, 0.0 }
 0x19b   :  { %281 = vmatmul.f32.gmra.mxu3 %v238_v31 }
 0x1a0   :  { %v219_v32 = vpop.f32.mrf.mxu2 }
 0x1a1   :  { %v239_v33 = vmax.f32 %v219_v32, 0.0 }
 0x1a3   :  { %284 = vmatmul.f32.gmra.mxu3 %v239_v33 }
 0x1a8   :  { %v222_v34 = vpop.f32.mrf.mxu2 }
 0x1a9   :  { %v240_v35 = vmax.f32 %v222_v34, 0.0 }
 0x1ab   :  { %287 = vmatmul.f32.gmra.mxu3 %v240_v35 }
 0x1b6   :  { %v225_v40 = vpop.f32.mrf.mxu2 }
 0x1b7   :  { %v241_v41 = vmax.f32 %v225_v40, 0.0 }
 0x1b9   :  { %290 = vmatmul.f32.gmra.mxu3 %v241_v41 }
 0x1be   :  { %v228_v46 = vpop.f32.mrf.mxu2 }
 0x1bf   :  { %v242_v47 = vmax.f32 %v228_v46, 0.0 }
 0x1c1   :  { %293 = vmatmul.f32.gmra.mxu3 %v242_v47 }
 0x1c6   :  { %v231_v52 = vpop.f32.mrf.mxu2 }
 0x1c7   :  { %v243_v53 = vmax.f32 %v231_v52, 0.0 }
 0x1c9   :  { %296 = vmatmul.f32.gmra.mxu3 %v243_v53 }
 0x1ce   :  { %v234_v56 = vpop.f32.mrf.mxu2 }
 0x1cf   :  { %v244_v57 = vmax.f32 %v234_v56, 0.0 }
 0x1d1   :  { %299 = vmatmul.f32.gmra.mxu3 %v244_v57 }
 0x216   :  { %v279_v60 = vpop.f32.mrf.mxu3 }
 0x217   :  { %v303_v61 = vmax.f32 %v279_v60, 0.0 }
 0x219   :  { %344 = vmatmul.f32.vlgmr.msrb.gmra.mxu0 %v303_v61 }
 0x21e   :  { %v282_v62 = vpop.f32.mrf.mxu3 }
 0x21f   :  { %v304_v63 = vmax.f32 %v282_v62, 0.0 }
 0x221   :  { %347 = vmatmul.f32.gmra.mxu0 %v304_v63 }
 0x226   :  { %v285_v0 = vpop.f32.mrf.mxu3 }
 0x227   :  { %v305_v1 = vmax.f32 %v285_v0, 0.0 }
 0x229   :  { %350 = vmatmul.f32.gmra.mxu0 %v305_v1 }
 0x22e   :  { %v288_v2 = vpop.f32.mrf.mxu3 }
 0x22f   :  { %v306_v3 = vmax.f32 %v288_v2, 0.0 }
 0x231   :  { %353 = vmatmul.f32.gmra.mxu0 %v306_v3 }
 0x23c   :  { %v291_v8 = vpop.f32.mrf.mxu3 }
 0x23d   :  { %v307_v9 = vmax.f32 %v291_v8, 0.0 }
 0x23f   :  { %356 = vmatmul.f32.gmra.mxu0 %v307_v9 }
 0x244   :  { %v294_v14 = vpop.f32.mrf.mxu3 }
 0x245   :  { %v308_v15 = vmax.f32 %v294_v14, 0.0 }
 0x247   :  { %359 = vmatmul.f32.gmra.mxu0 %v308_v15 }
 0x24c   :  { %v297_v20 = vpop.f32.mrf.mxu3 }
 0x24d   :  { %v309_v21 = vmax.f32 %v297_v20, 0.0 }
 0x24f   :  { %362 = vmatmul.f32.gmra.mxu0 %v309_v21 }
 0x254   :  { %v300_v24 = vpop.f32.mrf.mxu3 }
 0x255   :  { %v310_v25 = vmax.f32 %v300_v24, 0.0 }
 0x257   :  { %365 = vmatmul.f32.gmra.mxu0 %v310_v25 }
 0x296   :  { %v345_v28 = vpop.f32.mrf.mxu0 }
 0x297   :  { %v369_v29 = vmax.f32 %v345_v28, 0.0 }
 0x299   :  { %410 = vmatmul.f32.vlgmr.msrb.gmra.mxu1 %v369_v29 }
 0x29e   :  { %v348_v30 = vpop.f32.mrf.mxu0 }
 0x29f   :  { %v370_v31 = vmax.f32 %v348_v30, 0.0 }
 0x2a1   :  { %413 = vmatmul.f32.gmra.mxu1 %v370_v31 }
 0x2a6   :  { %v351_v32 = vpop.f32.mrf.mxu0 }
 0x2a7   :  { %v371_v33 = vmax.f32 %v351_v32, 0.0 }
 0x2a9   :  { %416 = vmatmul.f32.gmra.mxu1 %v371_v33 }
 0x2ae   :  { %v354_v34 = vpop.f32.mrf.mxu0 }
 0x2af   :  { %v372_v35 = vmax.f32 %v354_v34, 0.0 }
 0x2b1   :  { %419 = vmatmul.f32.gmra.mxu1 %v372_v35 }
 0x2bc   :  { %v357_v40 = vpop.f32.mrf.mxu0 }
 0x2bd   :  { %v373_v41 = vmax.f32 %v357_v40, 0.0 }
 0x2bf   :  { %422 = vmatmul.f32.gmra.mxu1 %v373_v41 }
 0x2c4   :  { %v360_v46 = vpop.f32.mrf.mxu0 }
 0x2c5   :  { %v374_v47 = vmax.f32 %v360_v46, 0.0 }
 0x2c7   :  { %425 = vmatmul.f32.gmra.mxu1 %v374_v47 }
 0x2cc   :  { %v363_v52 = vpop.f32.mrf.mxu0 }
 0x2cd   :  { %v375_v53 = vmax.f32 %v363_v52, 0.0 }
 0x2cf   :  { %428 = vmatmul.f32.gmra.mxu1 %v375_v53 }
 0x2d4   :  { %v366_v56 = vpop.f32.mrf.mxu0 }
 0x2d5   :  { %v376_v57 = vmax.f32 %v366_v56, 0.0 }
 0x2d7   :  { %431 = vmatmul.f32.gmra.mxu1 %v376_v57 }
 0x316   :  { %v411_v60 = vpop.f32.mrf.mxu1 }
 0x317   :  { %v435_v61 = vmax.f32 %v411_v60, 0.0 }
 0x319   :  { %476 = vmatmul.f32.vlgmr.msra.gmra.mxu1 %v435_v61 }
 0x31e   :  { %v414_v62 = vpop.f32.mrf.mxu1 }
 0x31f   :  { %v436_v63 = vmax.f32 %v414_v62, 0.0 }
 0x321   :  { %479 = vmatmul.f32.vlgmr.msrb.gmra.mxu2 %v436_v63 }
 0x326   :  { %v417_v0 = vpop.f32.mrf.mxu1 }
 0x327   :  { %v437_v1 = vmax.f32 %v417_v0, 0.0 }
 0x329   :  { %482 = vmatmul.f32.gmra.mxu2 %v437_v1 }
 0x32e   :  { %v420_v2 = vpop.f32.mrf.mxu1 }
 0x32f   :  { %v438_v3 = vmax.f32 %v420_v2, 0.0 }
 0x331   :  { %485 = vmatmul.f32.gmra.mxu2 %v438_v3 }
 0x33c   :  { %v423_v4 = vpop.f32.mrf.mxu1 }
 0x33d   :  { %v439_v5 = vmax.f32 %v423_v4, 0.0 }
 0x33f   :  { %488 = vmatmul.f32.gmra.mxu2 %v439_v5 }
 0x344   :  { %v426_v6 = vpop.f32.mrf.mxu1 }
 0x345   :  { %v440_v7 = vmax.f32 %v426_v6, 0.0 }
 0x347   :  { %491 = vmatmul.f32.gmra.mxu2 %v440_v7 }
 0x34c   :  { %v429_v8 = vpop.f32.mrf.mxu1 }
 0x34d   :  { %v441_v9 = vmax.f32 %v429_v8, 0.0 }
 0x34f   :  { %494 = vmatmul.f32.gmra.mxu2 %v441_v9 }
 0x354   :  { %v432_v10 = vpop.f32.mrf.mxu1 }
 0x355   :  { %v442_v11 = vmax.f32 %v432_v10, 0.0 }
 0x357   :  { %497 = vmatmul.f32.vlgmr.msra.gmra.mxu3 %v442_v11 }
 0x396   :  { %v477_v12 = vpop.f32.mrf.mxu1 }
 0x397   :  { %v501_v13 = vmax.f32 %v477_v12, 0.0 }
 0x399   :  { %510 = vst.msk [vmem:[%s695_s2] sm:$0xff] %vm509_vm1, %v501_v13 }
 0x3a4   :  { %v480_v14 = vpop.f32.mrf.mxu2 }
 0x3a5   :  { %v502_v15 = vmax.f32 %v480_v14, 0.0 }
 0x3a7   :  { %511 = vst.msk [vmem:[%s695_s2 + $0x8] sm:$0xff] %vm509_vm1, %v502_v15 }
 0x3ac   :  { %v483_v16 = vpop.f32.mrf.mxu2 }
 0x3ad   :  { %v503_v17 = vmax.f32 %v483_v16, 0.0 }
 0x3af   :  { %512 = vst.msk [vmem:[%s695_s2 + $0x10] sm:$0xff] %vm509_vm1, %v503_v17 }
 0x3b4   :  { %v486_v18 = vpop.f32.mrf.mxu2 }
 0x3b5   :  { %v504_v19 = vmax.f32 %v486_v18, 0.0 }
 0x3b7   :  { %513 = vst.msk [vmem:[%s695_s2 + $0x18] sm:$0xff] %vm509_vm1, %v504_v19 }
 0x3c2   :  { %v489_v20 = vpop.f32.mrf.mxu2 }
 0x3c3   :  { %v505_v21 = vmax.f32 %v489_v20, 0.0 }
 0x3c5   :  { %514 = vst.msk [vmem:[%s695_s2 + $0x20] sm:$0xff] %vm509_vm1, %v505_v21 }
 0x3ca   :  { %v492_v22 = vpop.f32.mrf.mxu2 }
 0x3cb   :  { %v506_v23 = vmax.f32 %v492_v22, 0.0 }
 0x3cd   :  { %515 = vst.msk [vmem:[%s695_s2 + $0x28] sm:$0xff] %vm509_vm1, %v506_v23 }
 0x3d2   :  { %v495_v24 = vpop.f32.mrf.mxu2 }
 0x3d3   :  { %v507_v25 = vmax.f32 %v495_v24, 0.0 }
 0x3d5   :  { %516 = vst.msk [vmem:[%s695_s2 + $0x30] sm:$0xff] %vm509_vm1, %v507_v25 }
 0x3da   :  { %v498_v26 = vpop.f32.mrf.mxu3 }
 0x3db   :  { %v508_v27 = vmax.f32 %v498_v26, 0.0 }
 0x3dd   :  { %517 = vst.msk [vmem:[%s695_s2 + $0x38] sm:$0xff] %vm509_vm1, %v508_v27 }
 0x3de   :  { %522 = vsyncpa [#allocation3], 1 }

</bundles_post_ra>
